<compile_context>
chip_gen: v7x
topology: tpu7x:2x2x1
jax: 0.10.0
libtpu: 0.0.40
codegen_flags: <defaults>
</compile_context>

<pallas_src>
from functools import partial

import jax
import jax.numpy as jnp
from jax.experimental import pallas as pl
from jax.experimental.pallas import tpu as pltpu


# ---------------------------------------------------------------------------
# Pallas kernel
# ---------------------------------------------------------------------------
def _flow_step_kernel(img_w, hw, n_img, cp,
                      x_ref, masks_ref, wf_ref, w1_ref, bmid_ref,
                      w2_ref, w3_ref, btail_ref,
                      y_ref, ldj_ref):
    n = x_ref.shape[-1]                      # lanes in this block = n_img*hw
    x = x_ref[...]                           # (C+1, n): activations + ones row

    # ActNorm + InvConv(1x1) + BN1-affine folded into one matmul; the bias
    # rides on the ones row of x.  Output rows (8-aligned slabs):
    #   [0   , cp )  x_change
    #   [cp  , 2cp)  x_id        (identity half of the coupling)
    #   [2cp , 3cp)  BN1(x_id)   (input of the coupling NN), pad rows == 0
    z = jnp.dot(wf_ref[...], x, preferred_element_type=jnp.float32)
    x_change = z[0:cp, :]
    x_id = z[cp:2 * cp, :]
    # identity half is unchanged by the coupling: aligned store now so its
    # writeback overlaps the coupling-NN compute below.
    y_ref[cp:2 * cp, :] = x_id
    h = jnp.maximum(z[2 * cp:3 * cp, :], 0.0)              # (cp, n)

    # --- conv1 (3x3 'same', BN2 gain folded): roll-based im2col on the SMALL
    #     cp-row input; 8-row-aligned pieces -> aligned concatenate ----------
    pieces = []
    k = 0
    for dh in (-1, 0, 1):
        for dw in (-1, 0, 1):
            off = dh * img_w + dw
            if off == 0:
                pieces.append(h)                           # center mask == 1
            else:
                pieces.append(pltpu.roll(h, (-off) % n, axis=1) * masks_ref[k])
            k += 1
    patch = jnp.concatenate(pieces, axis=0)                # (9*cp, n)

    bmid = bmid_ref[...]                                   # (M, 2): [b2 | b3]
    h = jnp.dot(w1_ref[...], patch, preferred_element_type=jnp.float32)
    h = jnp.maximum(h + bmid[:, 0:1], 0.0)                 # BN2 bias + relu

    # --- conv2 (1x1, BN3 gain folded) ---------------------------------------
    h = jnp.dot(w2_ref[...], h, preferred_element_type=jnp.float32)
    h = jnp.maximum(h + bmid[:, 1:2], 0.0)                 # BN3 bias + relu

    # --- conv3 (3x3 'same'): roll the SMALL (2cp-row) output instead of the
    #     large (M-row) input: st = b3 + sum_k mask_k * roll(W3_k @ h) -------
    btail = btail_ref[...]                                 # (2cp, 2)
    st = btail[:, 0:1]                                     # b3, broadcasts
    k = 0
    for dh in (-1, 0, 1):
        for dw in (-1, 0, 1):
            off = dh * img_w + dw
            u = jnp.dot(w3_ref[k], h, preferred_element_type=jnp.float32)
            if off == 0:
                st = st + u
            else:
                st = st + pltpu.roll(u, (-off) % n, axis=1) * masks_ref[k]
            k += 1

    # rows [0,cp) of st are the s channels, rows [cp,2cp) the t channels
    # (w3/b3 were pre-permuted + padded in glue)
    s = btail[0:cp, 1:2] * jnp.tanh(st[0:cp, :])           # (cp, n)
    t = st[cp:2 * cp, :]
    y_ref[0:cp, :] = (x_change + t) * jnp.exp(s)           # aligned store

    # per-image data-dependent log-det contribution: sum(s) over that image's
    # lane segment (pad rows of s are exactly zero)
    for j in range(n_img):
        sj = jnp.sum(s[:, j * hw:(j + 1) * hw])
        ldj_ref[:, j:j + 1, :] = jnp.broadcast_to(sj, (1, 1, 128))


# ---------------------------------------------------------------------------
# Wrapper (glue: parameter folding, layout, pallas_call)
# ---------------------------------------------------------------------------
def _pick_images_per_block(batch, hw, max_lanes=2048):
    """Largest images-per-block that keeps lane blocks <= max_lanes, blocks
    a multiple of 128 lanes, and (when possible) >= 2 grid steps."""
    if hw % 128 != 0:
        return batch                      # single full-extent lane block
    divs = [d for d in range(1, batch + 1) if batch % d == 0]
    feas = [d for d in divs if d * hw <= max_lanes] or [1]
    multi = [d for d in feas if batch // d >= 2]
    return max(multi) if multi else max(feas)


def flow_step(x_nchw, sldj, P):
    B, C, H, W = x_nchw.shape
    Cc = C // 2
    M = P['w1'].shape[0]
    HW = H * W
    Cp = ((Cc + 7) // 8) * 8              # 8-sublane-aligned half-channel slab
    eps = 1e-5

    bblk = _pick_images_per_block(B, HW)
    n_blocks = B // bblk
    n_lanes = bblk * HW
    ntot = B * HW

    # ---- layout: channel-first, images concatenated on the lane axis -------
    xf = x_nchw.astype(jnp.float32).reshape(B, C, HW)
    x_l = jnp.transpose(xf, (1, 0, 2)).reshape(C, ntot)
    x_aug = jnp.concatenate([x_l, jnp.ones((1, ntot), jnp.float32)], axis=0)

    # ---- parameter folding --------------------------------------------------
    def fold_bn(g, b, rm, rv):
        ge = g / jnp.sqrt(rv + eps)
        return ge, b - rm * ge

    g1, b1 = fold_bn(P['bn1_g'], P['bn1_b'], P['bn1_rm'], P['bn1_rv'])
    g2, b2 = fold_bn(P['bn2_g'], P['bn2_b'], P['bn2_rm'], P['bn2_rv'])
    g3, b3n = fold_bn(P['bn3_g'], P['bn3_b'], P['bn3_rm'], P['bn3_rv'])

    # ActNorm folded into the invertible 1x1 conv; BN1 folded into extra rows;
    # biases ride on the appended ones row of x.
    scale = jnp.exp(P['an_logs'])
    wf = P['inv_w'] * scale[None, :]
    bf = wf @ P['an_bias']
    wf_aug = jnp.zeros((3 * Cp, C + 1), jnp.float32)
    wf_aug = wf_aug.at[0:Cc, :C].set(wf[:Cc]).at[0:Cc, C].set(bf[:Cc])
    wf_aug = (wf_aug.at[Cp:Cp + Cc, :C].set(wf[Cc:])
                    .at[Cp:Cp + Cc, C].set(bf[Cc:]))
    wf_aug = (wf_aug.at[2 * Cp:2 * Cp + Cc, :C].set(g1[:, None] * wf[Cc:])
                    .at[2 * Cp:2 * Cp + Cc, C].set(g1 * bf[Cc:] + b1))

    # conv1 weights: fold BN2 gain, pad in-channels Cc -> Cp; column order
    # k*Cp + i with k = (dh+1)*3 + (dw+1) matching the in-kernel im2col.
    w1g = P['w1'] * g2[:, None, None, None]                    # (M, Cc, 3, 3)
    w1p = jnp.zeros((M, Cp, 3, 3), jnp.float32).at[:, :Cc].set(w1g)
    w1m = jnp.transpose(w1p, (0, 2, 3, 1)).reshape(M, 9 * Cp)

    # conv2 weights: fold BN3 gain
    w2m = P['w2'][:, :, 0, 0] * g3[:, None]                    # (M, M)

    # conv3: permute outputs so rows [:Cc]=s, [Cc:]=t (torch's 0::2 / 1::2),
    # pad each half to Cp rows and split per 3x3 tap -> (9, 2*Cp, M)
    perm = jnp.concatenate([jnp.arange(0, C, 2), jnp.arange(1, C, 2)])
    w3perm = P['w3'][perm]                                     # (C, M, 3, 3)
    b3perm = P['b3'][perm]
    w3p = (jnp.zeros((2 * Cp, M, 3, 3), jnp.float32)
              .at[0:Cc].set(w3perm[:Cc]).at[Cp:Cp + Cc].set(w3perm[Cc:]))
    w3k = jnp.transpose(w3p, (2, 3, 0, 1)).reshape(9, 2 * Cp, M)

    # packed per-channel constants
    bmid = jnp.stack([b2, b3n], axis=1)                        # (M, 2)
    btail = jnp.zeros((2 * Cp, 2), jnp.float32)
    btail = (btail.at[0:Cc, 0].set(b3perm[:Cc])
                  .at[Cp:Cp + Cc, 0].set(b3perm[Cc:])
                  .at[0:Cc, 1].set(P['coup_scale']))

    # boundary-validity masks for the roll-based convs, tiled per image so
    # cross-image roll wrap is zeroed.
    hh = jnp.arange(H)[:, None]
    ww = jnp.arange(W)[None, :]
    mlist = []
    for dh in (-1, 0, 1):
        for dw in (-1, 0, 1):
            m = ((hh + dh >= 0) & (hh + dh < H) &
                 (ww + dw >= 0) & (ww + dw < W))
            mlist.append(m.reshape(HW))
    masks = jnp.tile(jnp.stack(mlist).astype(jnp.float32), (1, bblk))
    masks = masks.reshape(9, 1, n_lanes)

    args = [x_aug, masks, wf_aug, w1m, bmid, w2m, w3k, btail]

    def const_spec(a):
        return pl.BlockSpec(a.shape, lambda i, _z=(0,) * a.ndim: _z)

    in_specs = [pl.BlockSpec((C + 1, n_lanes), lambda i: (0, i))]
    in_specs += [const_spec(a) for a in args[1:]]
    out_specs = [pl.BlockSpec((2 * Cp, n_lanes), lambda i: (0, i)),
                 pl.BlockSpec((1, bblk, 128), lambda i: (i, 0, 0))]

    y_pad, ldj = pl.pallas_call(
        partial(_flow_step_kernel, W, HW, bblk, Cp),
        out_shape=(jax.ShapeDtypeStruct((2 * Cp, ntot), jnp.float32),
                   jax.ShapeDtypeStruct((n_blocks, bblk, 128), jnp.float32)),
        grid_spec=pltpu.PrefetchScalarGridSpec(
            num_scalar_prefetch=0, grid=(n_blocks,),
            in_specs=in_specs, out_specs=out_specs),
        compiler_params=pltpu.CompilerParams(
            dimension_semantics=("parallel",),
            vmem_limit_bytes=32 * 1024 * 1024),
    )(*args)

    # un-pad / un-batch the outputs
    yc = y_pad[0:Cc].reshape(Cc, B, HW)
    yi = y_pad[Cp:Cp + Cc].reshape(Cc, B, HW)
    y = jnp.transpose(jnp.concatenate([yc, yi], axis=0), (1, 0, 2))
    y = y.reshape(B, C, H, W)

    # parameter-only log-det terms (host side; no clean Pallas slogdet):
    const_ldj = (P['an_logs'].sum()
                 + jnp.linalg.slogdet(P['inv_w'])[1]) * H * W
    if sldj is None:
        sldj = jnp.zeros((B,), jnp.float32)
    sldj_out = sldj + const_ldj + ldj[:, :, 0].reshape(B)
    return y, sldj_out


# ---------------------------------------------------------------------------
# Pure-JAX reference (NCHW, mirrors the PyTorch forward) for verification
# ---------------------------------------------------------------------------
def ref_flow_step(x, sldj, P):
    B, C, H, W = x.shape
    Cc = C // 2
    eps = 1e-5

    # ActNorm
    xx = (x + P['an_bias'][None, :, None, None]) \
        * jnp.exp(P['an_logs'])[None, :, None, None]
    sldj = sldj + P['an_logs'].sum() * H * W

    # InvConv (1x1)
    xx = jnp.einsum('oc,nchw->nohw', P['inv_w'], xx)
    sldj = sldj + jnp.linalg.slogdet(P['inv_w'])[1] * H * W

    # Affine coupling
    x_change, x_id = xx[:, :Cc], xx[:, Cc:]

    def bn(h, g, b, rm, rv):
        return ((h - rm[None, :, None, None])
                / jnp.sqrt(rv + eps)[None, :, None, None]
                * g[None, :, None, None] + b[None, :, None, None])

    def conv(h, w, pad):
        return jax.lax.conv_general_dilated(
            h, w, (1, 1), [(pad, pad), (pad, pad)],
            dimension_numbers=('NCHW', 'OIHW', 'NCHW'))

    h = jax.nn.relu(bn(x_id, P['bn1_g'], P['bn1_b'], P['bn1_rm'], P['bn1_rv']))
    h = conv(h, P['w1'], 1)
    h = jax.nn.relu(bn(h, P['bn2_g'], P['bn2_b'], P['bn2_rm'], P['bn2_rv']))
    h = conv(h, P['w2'], 0)
    h = jax.nn.relu(bn(h, P['bn3_g'], P['bn3_b'], P['bn3_rm'], P['bn3_rv']))
    st = conv(h, P['w3'], 1) + P['b3'][None, :, None, None]

    s, t = st[:, 0::2], st[:, 1::2]
    s = P['coup_scale'][None, :, None, None] * jnp.tanh(s)
    x_change = (x_change + t) * jnp.exp(s)
    sldj = sldj + s.reshape(B, -1).sum(-1)
    y = jnp.concatenate([x_change, x_id], axis=1)
    return y, sldj


# ---------------------------------------------------------------------------
# Deterministic synthetic parameters (shapes implied by the module __init__)
# ---------------------------------------------------------------------------
def make_params(C, M, key):
    Cc = C // 2
    k = jax.random.split(key, 20)
    inv_w = jnp.linalg.qr(jax.random.normal(k[2], (C, C)))[0]   # orthogonal init
    P = dict(
        an_bias=0.1 * jax.random.normal(k[0], (C,)),
        an_logs=0.1 * jax.random.normal(k[1], (C,)),
        inv_w=inv_w,
        # NN weights (torch OIHW layout). NOTE: real Glow zero-inits out_conv;
        # small random values are used here so the compute path is exercised.
        w1=0.05 * jax.random.normal(k[3], (M, Cc, 3, 3)),
        w2=0.05 * jax.random.normal(k[4], (M, M, 1, 1)),
        w3=0.05 * jax.random.normal(k[5], (C, M, 3, 3)),
        b3=0.05 * jax.random.normal(k[6], (C,)),
        coup_scale=jnp.ones((Cc,), jnp.float32),
        # BatchNorm2d (eval-mode running stats)
        bn1_g=1.0 + 0.1 * jax.random.normal(k[7], (Cc,)),
        bn1_b=0.1 * jax.random.normal(k[8], (Cc,)),
        bn1_rm=0.1 * jax.random.normal(k[9], (Cc,)),
        bn1_rv=1.0 + 0.1 * jnp.abs(jax.random.normal(k[10], (Cc,))),
        bn2_g=1.0 + 0.1 * jax.random.normal(k[11], (M,)),
        bn2_b=0.1 * jax.random.normal(k[12], (M,)),
        bn2_rm=0.1 * jax.random.normal(k[13], (M,)),
        bn2_rv=1.0 + 0.1 * jnp.abs(jax.random.normal(k[14], (M,))),
        bn3_g=1.0 + 0.1 * jax.random.normal(k[15], (M,)),
        bn3_b=0.1 * jax.random.normal(k[16], (M,)),
        bn3_rm=0.1 * jax.random.normal(k[17], (M,)),
        bn3_rv=1.0 + 0.1 * jnp.abs(jax.random.normal(k[18], (M,))),
    )
    return {n: v.astype(jnp.float32) for n, v in P.items()}


if __name__ == "__main__":
    B, C, H, W, MID = 4, 4, 16, 16, 32
    key = jax.random.PRNGKey(0)
    P = make_params(C, MID, key)
    x = jax.random.normal(jax.random.fold_in(key, 99), (B, C, H, W), jnp.float32)
    sldj = jnp.zeros((B,), jnp.float32)

    y, sldj_out = jax.jit(flow_step)(x, sldj, P)
    jax.block_until_ready((y, sldj_out))

    y_ref, sldj_ref = ref_flow_step(x, sldj, P)
    assert y.shape == (B, C, H, W) and sldj_out.shape == (B,)
    assert jnp.allclose(y, y_ref, atol=3e-3, rtol=3e-3), \
        f"max err {jnp.max(jnp.abs(y - y_ref))}"
    assert jnp.allclose(sldj_out, sldj_ref, atol=5e-2, rtol=1e-3), \
        f"sldj err {jnp.max(jnp.abs(sldj_out - sldj_ref))}"
    print("KERNEL_OK")
</pallas_src>

<mosaic_0001>
module attributes {stable_mosaic.version = 11 : i64} {
  func.func @_flow_step_kernel(%arg0: i32, %arg1: memref<5x512xf32, #tpu.memory_space<vmem>>, %arg2: memref<9x1x512xf32, #tpu.memory_space<vmem>>, %arg3: memref<24x5xf32, #tpu.memory_space<vmem>>, %arg4: memref<32x72xf32, #tpu.memory_space<vmem>>, %arg5: memref<32x2xf32, #tpu.memory_space<vmem>>, %arg6: memref<32x32xf32, #tpu.memory_space<vmem>>, %arg7: memref<9x16x32xf32, #tpu.memory_space<vmem>>, %arg8: memref<16x2xf32, #tpu.memory_space<vmem>>, %arg9: memref<16x512xf32, #tpu.memory_space<vmem>>, %arg10: memref<1x2x128xf32, #tpu.memory_space<vmem>>) attributes {dimension_semantics = [#tpu.dimension_semantics<parallel>], iteration_bounds = array<i64: 2>, scalar_prefetch = 0 : i64, scratch_operands = 0 : i64, tpu.core_type = #tpu.core_type<tc>, window_params = [{transform_indices = @transform_0, window_bounds = array<i64: 5, 512>}, {pipeline_mode = #tpu.pipeline_mode<synchronous>, transform_indices = @transform_1, window_bounds = array<i64: 9, 1, 512>}, {pipeline_mode = #tpu.pipeline_mode<synchronous>, transform_indices = @transform_2, window_bounds = array<i64: 24, 5>}, {pipeline_mode = #tpu.pipeline_mode<synchronous>, transform_indices = @transform_3, window_bounds = array<i64: 32, 72>}, {pipeline_mode = #tpu.pipeline_mode<synchronous>, transform_indices = @transform_4, window_bounds = array<i64: 32, 2>}, {pipeline_mode = #tpu.pipeline_mode<synchronous>, transform_indices = @transform_5, window_bounds = array<i64: 32, 32>}, {pipeline_mode = #tpu.pipeline_mode<synchronous>, transform_indices = @transform_6, window_bounds = array<i64: 9, 16, 32>}, {pipeline_mode = #tpu.pipeline_mode<synchronous>, transform_indices = @transform_7, window_bounds = array<i64: 16, 2>}, {transform_indices = @transform_8, window_bounds = array<i64: 16, 512>}, {transform_indices = @transform_9, window_bounds = array<i64: 1, 2, 128>}]} {
    %c0 = arith.constant 0 : index
    %c0_0 = arith.constant 0 : index
    %0 = vector.load %arg1[%c0, %c0_0] : memref<5x512xf32, #tpu.memory_space<vmem>>, vector<5x512xf32>
    %c0_1 = arith.constant 0 : index
    %c0_2 = arith.constant 0 : index
    %1 = vector.load %arg3[%c0_1, %c0_2] : memref<24x5xf32, #tpu.memory_space<vmem>>, vector<24x5xf32>
    %cst = arith.constant dense<0.000000e+00> : vector<24x512xf32>
    %2 = tpu.matmul %1, %0, %cst {dimension_numbers = #tpu.dot_dimension_numbers<[1], [0], [0], [1], [0, 0, 1, 1], [], []>} : vector<24x5xf32>, vector<5x512xf32>, vector<24x512xf32> -> vector<24x512xf32>
    %3 = vector.extract_strided_slice %2 {offsets = [0, 0], sizes = [8, 512], strides = [1, 1]} : vector<24x512xf32> to vector<8x512xf32>
    %4 = vector.extract_strided_slice %2 {offsets = [8, 0], sizes = [8, 512], strides = [1, 1]} : vector<24x512xf32> to vector<8x512xf32>
    %c8 = arith.constant 8 : index
    %c0_3 = arith.constant 0 : index
    %5 = vector.load %arg9[%c8, %c0_3] : memref<16x512xf32, #tpu.memory_space<vmem>>, vector<8x512xf32>
    tpu.vector_store %arg9[%c8, %c0_3], %4 {strides = array<i32>} : memref<16x512xf32, #tpu.memory_space<vmem>>, vector<8x512xf32>,
    %6 = vector.extract_strided_slice %2 {offsets = [16, 0], sizes = [8, 512], strides = [1, 1]} : vector<24x512xf32> to vector<8x512xf32>
    %cst_4 = arith.constant 0.000000e+00 : f32
    %7 = vector.broadcast %cst_4 : f32 to vector<8x512xf32>
    %8 = arith.maximumf %6, %7 : vector<8x512xf32>
    %c17_i32 = arith.constant 17 : i32
    %9 = tpu.dynamic_rotate %8 by %c17_i32 dim 1 : vector<8x512xf32>, i32 -> vector<8x512xf32>
    %c0_5 = arith.constant 0 : index
    %c0_6 = arith.constant 0 : index
    %c0_7 = arith.constant 0 : index
    %10 = vector.load %arg2[%c0_5, %c0_6, %c0_7] : memref<9x1x512xf32, #tpu.memory_space<vmem>>, vector<1x1x512xf32>
    %11 = vector.shape_cast %10 : vector<1x1x512xf32> to vector<1x512xf32>
    %12 = vector.broadcast %11 : vector<1x512xf32> to vector<8x512xf32>
    %13 = arith.mulf %9, %12 : vector<8x512xf32>
    %c16_i32 = arith.constant 16 : i32
    %14 = tpu.dynamic_rotate %8 by %c16_i32 dim 1 : vector<8x512xf32>, i32 -> vector<8x512xf32>
    %c1 = arith.constant 1 : index
    %c0_8 = arith.constant 0 : index
    %c0_9 = arith.constant 0 : index
    %15 = vector.load %arg2[%c1, %c0_8, %c0_9] : memref<9x1x512xf32, #tpu.memory_space<vmem>>, vector<1x1x512xf32>
    %16 = vector.shape_cast %15 : vector<1x1x512xf32> to vector<1x512xf32>
    %17 = vector.broadcast %16 : vector<1x512xf32> to vector<8x512xf32>
    %18 = arith.mulf %14, %17 : vector<8x512xf32>
    %c15_i32 = arith.constant 15 : i32
    %19 = tpu.dynamic_rotate %8 by %c15_i32 dim 1 : vector<8x512xf32>, i32 -> vector<8x512xf32>
    %c2 = arith.constant 2 : index
    %c0_10 = arith.constant 0 : index
    %c0_11 = arith.constant 0 : index
    %20 = vector.load %arg2[%c2, %c0_10, %c0_11] : memref<9x1x512xf32, #tpu.memory_space<vmem>>, vector<1x1x512xf32>
    %21 = vector.shape_cast %20 : vector<1x1x512xf32> to vector<1x512xf32>
    %22 = vector.broadcast %21 : vector<1x512xf32> to vector<8x512xf32>
    %23 = arith.mulf %19, %22 : vector<8x512xf32>
    %c1_i32 = arith.constant 1 : i32
    %24 = tpu.dynamic_rotate %8 by %c1_i32 dim 1 : vector<8x512xf32>, i32 -> vector<8x512xf32>
    %c3 = arith.constant 3 : index
    %c0_12 = arith.constant 0 : index
    %c0_13 = arith.constant 0 : index
    %25 = vector.load %arg2[%c3, %c0_12, %c0_13] : memref<9x1x512xf32, #tpu.memory_space<vmem>>, vector<1x1x512xf32>
    %26 = vector.shape_cast %25 : vector<1x1x512xf32> to vector<1x512xf32>
    %27 = vector.broadcast %26 : vector<1x512xf32> to vector<8x512xf32>
    %28 = arith.mulf %24, %27 : vector<8x512xf32>
    %c511_i32 = arith.constant 511 : i32
    %29 = tpu.dynamic_rotate %8 by %c511_i32 dim 1 : vector<8x512xf32>, i32 -> vector<8x512xf32>
    %c5 = arith.constant 5 : index
    %c0_14 = arith.constant 0 : index
    %c0_15 = arith.constant 0 : index
    %30 = vector.load %arg2[%c5, %c0_14, %c0_15] : memref<9x1x512xf32, #tpu.memory_space<vmem>>, vector<1x1x512xf32>
    %31 = vector.shape_cast %30 : vector<1x1x512xf32> to vector<1x512xf32>
    %32 = vector.broadcast %31 : vector<1x512xf32> to vector<8x512xf32>
    %33 = arith.mulf %29, %32 : vector<8x512xf32>
    %c497_i32 = arith.constant 497 : i32
    %34 = tpu.dynamic_rotate %8 by %c497_i32 dim 1 : vector<8x512xf32>, i32 -> vector<8x512xf32>
    %c6 = arith.constant 6 : index
    %c0_16 = arith.constant 0 : index
    %c0_17 = arith.constant 0 : index
    %35 = vector.load %arg2[%c6, %c0_16, %c0_17] : memref<9x1x512xf32, #tpu.memory_space<vmem>>, vector<1x1x512xf32>
    %36 = vector.shape_cast %35 : vector<1x1x512xf32> to vector<1x512xf32>
    %37 = vector.broadcast %36 : vector<1x512xf32> to vector<8x512xf32>
    %38 = arith.mulf %34, %37 : vector<8x512xf32>
    %c496_i32 = arith.constant 496 : i32
    %39 = tpu.dynamic_rotate %8 by %c496_i32 dim 1 : vector<8x512xf32>, i32 -> vector<8x512xf32>
    %c7 = arith.constant 7 : index
    %c0_18 = arith.constant 0 : index
    %c0_19 = arith.constant 0 : index
    %40 = vector.load %arg2[%c7, %c0_18, %c0_19] : memref<9x1x512xf32, #tpu.memory_space<vmem>>, vector<1x1x512xf32>
    %41 = vector.shape_cast %40 : vector<1x1x512xf32> to vector<1x512xf32>
    %42 = vector.broadcast %41 : vector<1x512xf32> to vector<8x512xf32>
    %43 = arith.mulf %39, %42 : vector<8x512xf32>
    %c495_i32 = arith.constant 495 : i32
    %44 = tpu.dynamic_rotate %8 by %c495_i32 dim 1 : vector<8x512xf32>, i32 -> vector<8x512xf32>
    %c8_20 = arith.constant 8 : index
    %c0_21 = arith.constant 0 : index
    %c0_22 = arith.constant 0 : index
    %45 = vector.load %arg2[%c8_20, %c0_21, %c0_22] : memref<9x1x512xf32, #tpu.memory_space<vmem>>, vector<1x1x512xf32>
    %46 = vector.shape_cast %45 : vector<1x1x512xf32> to vector<1x512xf32>
    %47 = vector.broadcast %46 : vector<1x512xf32> to vector<8x512xf32>
    %48 = arith.mulf %44, %47 : vector<8x512xf32>
    %49 = tpu.concatenate %13, %18, %23, %28, %8, %33, %38, %43, %48 in 0 : vector<8x512xf32>, vector<8x512xf32>, vector<8x512xf32>, vector<8x512xf32>, vector<8x512xf32>, vector<8x512xf32>, vector<8x512xf32>, vector<8x512xf32>, vector<8x512xf32> -> vector<72x512xf32>
    %c0_23 = arith.constant 0 : index
    %c0_24 = arith.constant 0 : index
    %50 = vector.load %arg5[%c0_23, %c0_24] : memref<32x2xf32, #tpu.memory_space<vmem>>, vector<32x2xf32>
    %c0_25 = arith.constant 0 : index
    %c0_26 = arith.constant 0 : index
    %51 = vector.load %arg4[%c0_25, %c0_26] : memref<32x72xf32, #tpu.memory_space<vmem>>, vector<32x72xf32>
    %cst_27 = arith.constant dense<0.000000e+00> : vector<32x512xf32>
    %52 = tpu.matmul %51, %49, %cst_27 {dimension_numbers = #tpu.dot_dimension_numbers<[1], [0], [0], [1], [0, 0, 1, 1], [], []>} : vector<32x72xf32>, vector<72x512xf32>, vector<32x512xf32> -> vector<32x512xf32>
    %53 = vector.extract_strided_slice %50 {offsets = [0, 0], sizes = [32, 1], strides = [1, 1]} : vector<32x2xf32> to vector<32x1xf32>
    %54 = vector.broadcast %53 : vector<32x1xf32> to vector<32x512xf32>
    %55 = arith.addf %52, %54 : vector<32x512xf32>
    %cst_28 = arith.constant 0.000000e+00 : f32
    %56 = vector.broadcast %cst_28 : f32 to vector<32x512xf32>
    %57 = arith.maximumf %55, %56 : vector<32x512xf32>
    %c0_29 = arith.constant 0 : index
    %c0_30 = arith.constant 0 : index
    %58 = vector.load %arg6[%c0_29, %c0_30] : memref<32x32xf32, #tpu.memory_space<vmem>>, vector<32x32xf32>
    %cst_31 = arith.constant dense<0.000000e+00> : vector<32x512xf32>
    %59 = tpu.matmul %58, %57, %cst_31 {dimension_numbers = #tpu.dot_dimension_numbers<[1], [0], [0], [1], [0, 0, 1, 1], [], []>} : vector<32x32xf32>, vector<32x512xf32>, vector<32x512xf32> -> vector<32x512xf32>
    %60 = vector.extract_strided_slice %50 {offsets = [0, 1], sizes = [32, 1], strides = [1, 1]} : vector<32x2xf32> to vector<32x1xf32>
    %61 = vector.broadcast %60 : vector<32x1xf32> to vector<32x512xf32>
    %62 = arith.addf %59, %61 : vector<32x512xf32>
    %cst_32 = arith.constant 0.000000e+00 : f32
    %63 = vector.broadcast %cst_32 : f32 to vector<32x512xf32>
    %64 = arith.maximumf %62, %63 : vector<32x512xf32>
    %c0_33 = arith.constant 0 : index
    %c0_34 = arith.constant 0 : index
    %65 = vector.load %arg8[%c0_33, %c0_34] : memref<16x2xf32, #tpu.memory_space<vmem>>, vector<16x2xf32>
    %66 = vector.extract_strided_slice %65 {offsets = [0, 0], sizes = [16, 1], strides = [1, 1]} : vector<16x2xf32> to vector<16x1xf32>
    %c0_35 = arith.constant 0 : index
    %c0_36 = arith.constant 0 : index
    %c0_37 = arith.constant 0 : index
    %67 = vector.load %arg7[%c0_35, %c0_36, %c0_37] : memref<9x16x32xf32, #tpu.memory_space<vmem>>, vector<1x16x32xf32>
    %68 = vector.shape_cast %67 : vector<1x16x32xf32> to vector<16x32xf32>
    %cst_38 = arith.constant dense<0.000000e+00> : vector<16x512xf32>
    %69 = tpu.matmul %68, %64, %cst_38 {dimension_numbers = #tpu.dot_dimension_numbers<[1], [0], [0], [1], [0, 0, 1, 1], [], []>} : vector<16x32xf32>, vector<32x512xf32>, vector<16x512xf32> -> vector<16x512xf32>
    %c17_i32_39 = arith.constant 17 : i32
    %70 = tpu.dynamic_rotate %69 by %c17_i32_39 dim 1 : vector<16x512xf32>, i32 -> vector<16x512xf32>
    %c0_40 = arith.constant 0 : index
    %c0_41 = arith.constant 0 : index
    %c0_42 = arith.constant 0 : index
    %71 = vector.load %arg2[%c0_40, %c0_41, %c0_42] : memref<9x1x512xf32, #tpu.memory_space<vmem>>, vector<1x1x512xf32>
    %72 = vector.shape_cast %71 : vector<1x1x512xf32> to vector<1x512xf32>
    %73 = vector.broadcast %72 : vector<1x512xf32> to vector<16x512xf32>
    %74 = arith.mulf %70, %73 : vector<16x512xf32>
    %75 = vector.broadcast %66 : vector<16x1xf32> to vector<16x512xf32>
    %76 = arith.addf %75, %74 : vector<16x512xf32>
    %c1_43 = arith.constant 1 : index
    %c0_44 = arith.constant 0 : index
    %c0_45 = arith.constant 0 : index
    %77 = vector.load %arg7[%c1_43, %c0_44, %c0_45] : memref<9x16x32xf32, #tpu.memory_space<vmem>>, vector<1x16x32xf32>
    %78 = vector.shape_cast %77 : vector<1x16x32xf32> to vector<16x32xf32>
    %cst_46 = arith.constant dense<0.000000e+00> : vector<16x512xf32>
    %79 = tpu.matmul %78, %64, %cst_46 {dimension_numbers = #tpu.dot_dimension_numbers<[1], [0], [0], [1], [0, 0, 1, 1], [], []>} : vector<16x32xf32>, vector<32x512xf32>, vector<16x512xf32> -> vector<16x512xf32>
    %c16_i32_47 = arith.constant 16 : i32
    %80 = tpu.dynamic_rotate %79 by %c16_i32_47 dim 1 : vector<16x512xf32>, i32 -> vector<16x512xf32>
    %c1_48 = arith.constant 1 : index
    %c0_49 = arith.constant 0 : index
    %c0_50 = arith.constant 0 : index
    %81 = vector.load %arg2[%c1_48, %c0_49, %c0_50] : memref<9x1x512xf32, #tpu.memory_space<vmem>>, vector<1x1x512xf32>
    %82 = vector.shape_cast %81 : vector<1x1x512xf32> to vector<1x512xf32>
    %83 = vector.broadcast %82 : vector<1x512xf32> to vector<16x512xf32>
    %84 = arith.mulf %80, %83 : vector<16x512xf32>
    %85 = arith.addf %76, %84 : vector<16x512xf32>
    %c2_51 = arith.constant 2 : index
    %c0_52 = arith.constant 0 : index
    %c0_53 = arith.constant 0 : index
    %86 = vector.load %arg7[%c2_51, %c0_52, %c0_53] : memref<9x16x32xf32, #tpu.memory_space<vmem>>, vector<1x16x32xf32>
    %87 = vector.shape_cast %86 : vector<1x16x32xf32> to vector<16x32xf32>
    %cst_54 = arith.constant dense<0.000000e+00> : vector<16x512xf32>
    %88 = tpu.matmul %87, %64, %cst_54 {dimension_numbers = #tpu.dot_dimension_numbers<[1], [0], [0], [1], [0, 0, 1, 1], [], []>} : vector<16x32xf32>, vector<32x512xf32>, vector<16x512xf32> -> vector<16x512xf32>
    %c15_i32_55 = arith.constant 15 : i32
    %89 = tpu.dynamic_rotate %88 by %c15_i32_55 dim 1 : vector<16x512xf32>, i32 -> vector<16x512xf32>
    %c2_56 = arith.constant 2 : index
    %c0_57 = arith.constant 0 : index
    %c0_58 = arith.constant 0 : index
    %90 = vector.load %arg2[%c2_56, %c0_57, %c0_58] : memref<9x1x512xf32, #tpu.memory_space<vmem>>, vector<1x1x512xf32>
    %91 = vector.shape_cast %90 : vector<1x1x512xf32> to vector<1x512xf32>
    %92 = vector.broadcast %91 : vector<1x512xf32> to vector<16x512xf32>
    %93 = arith.mulf %89, %92 : vector<16x512xf32>
    %94 = arith.addf %85, %93 : vector<16x512xf32>
    %c3_59 = arith.constant 3 : index
    %c0_60 = arith.constant 0 : index
    %c0_61 = arith.constant 0 : index
    %95 = vector.load %arg7[%c3_59, %c0_60, %c0_61] : memref<9x16x32xf32, #tpu.memory_space<vmem>>, vector<1x16x32xf32>
    %96 = vector.shape_cast %95 : vector<1x16x32xf32> to vector<16x32xf32>
    %cst_62 = arith.constant dense<0.000000e+00> : vector<16x512xf32>
    %97 = tpu.matmul %96, %64, %cst_62 {dimension_numbers = #tpu.dot_dimension_numbers<[1], [0], [0], [1], [0, 0, 1, 1], [], []>} : vector<16x32xf32>, vector<32x512xf32>, vector<16x512xf32> -> vector<16x512xf32>
    %c1_i32_63 = arith.constant 1 : i32
    %98 = tpu.dynamic_rotate %97 by %c1_i32_63 dim 1 : vector<16x512xf32>, i32 -> vector<16x512xf32>
    %c3_64 = arith.constant 3 : index
    %c0_65 = arith.constant 0 : index
    %c0_66 = arith.constant 0 : index
    %99 = vector.load %arg2[%c3_64, %c0_65, %c0_66] : memref<9x1x512xf32, #tpu.memory_space<vmem>>, vector<1x1x512xf32>
    %100 = vector.shape_cast %99 : vector<1x1x512xf32> to vector<1x512xf32>
    %101 = vector.broadcast %100 : vector<1x512xf32> to vector<16x512xf32>
    %102 = arith.mulf %98, %101 : vector<16x512xf32>
    %103 = arith.addf %94, %102 : vector<16x512xf32>
    %c4 = arith.constant 4 : index
    %c0_67 = arith.constant 0 : index
    %c0_68 = arith.constant 0 : index
    %104 = vector.load %arg7[%c4, %c0_67, %c0_68] : memref<9x16x32xf32, #tpu.memory_space<vmem>>, vector<1x16x32xf32>
    %105 = vector.shape_cast %104 : vector<1x16x32xf32> to vector<16x32xf32>
    %cst_69 = arith.constant dense<0.000000e+00> : vector<16x512xf32>
    %106 = tpu.matmul %105, %64, %cst_69 {dimension_numbers = #tpu.dot_dimension_numbers<[1], [0], [0], [1], [0, 0, 1, 1], [], []>} : vector<16x32xf32>, vector<32x512xf32>, vector<16x512xf32> -> vector<16x512xf32>
    %107 = arith.addf %103, %106 : vector<16x512xf32>
    %c5_70 = arith.constant 5 : index
    %c0_71 = arith.constant 0 : index
    %c0_72 = arith.constant 0 : index
    %108 = vector.load %arg7[%c5_70, %c0_71, %c0_72] : memref<9x16x32xf32, #tpu.memory_space<vmem>>, vector<1x16x32xf32>
    %109 = vector.shape_cast %108 : vector<1x16x32xf32> to vector<16x32xf32>
    %cst_73 = arith.constant dense<0.000000e+00> : vector<16x512xf32>
    %110 = tpu.matmul %109, %64, %cst_73 {dimension_numbers = #tpu.dot_dimension_numbers<[1], [0], [0], [1], [0, 0, 1, 1], [], []>} : vector<16x32xf32>, vector<32x512xf32>, vector<16x512xf32> -> vector<16x512xf32>
    %c511_i32_74 = arith.constant 511 : i32
    %111 = tpu.dynamic_rotate %110 by %c511_i32_74 dim 1 : vector<16x512xf32>, i32 -> vector<16x512xf32>
    %c5_75 = arith.constant 5 : index
    %c0_76 = arith.constant 0 : index
    %c0_77 = arith.constant 0 : index
    %112 = vector.load %arg2[%c5_75, %c0_76, %c0_77] : memref<9x1x512xf32, #tpu.memory_space<vmem>>, vector<1x1x512xf32>
    %113 = vector.shape_cast %112 : vector<1x1x512xf32> to vector<1x512xf32>
    %114 = vector.broadcast %113 : vector<1x512xf32> to vector<16x512xf32>
    %115 = arith.mulf %111, %114 : vector<16x512xf32>
    %116 = arith.addf %107, %115 : vector<16x512xf32>
    %c6_78 = arith.constant 6 : index
    %c0_79 = arith.constant 0 : index
    %c0_80 = arith.constant 0 : index
    %117 = vector.load %arg7[%c6_78, %c0_79, %c0_80] : memref<9x16x32xf32, #tpu.memory_space<vmem>>, vector<1x16x32xf32>
    %118 = vector.shape_cast %117 : vector<1x16x32xf32> to vector<16x32xf32>
    %cst_81 = arith.constant dense<0.000000e+00> : vector<16x512xf32>
    %119 = tpu.matmul %118, %64, %cst_81 {dimension_numbers = #tpu.dot_dimension_numbers<[1], [0], [0], [1], [0, 0, 1, 1], [], []>} : vector<16x32xf32>, vector<32x512xf32>, vector<16x512xf32> -> vector<16x512xf32>
    %c497_i32_82 = arith.constant 497 : i32
    %120 = tpu.dynamic_rotate %119 by %c497_i32_82 dim 1 : vector<16x512xf32>, i32 -> vector<16x512xf32>
    %c6_83 = arith.constant 6 : index
    %c0_84 = arith.constant 0 : index
    %c0_85 = arith.constant 0 : index
    %121 = vector.load %arg2[%c6_83, %c0_84, %c0_85] : memref<9x1x512xf32, #tpu.memory_space<vmem>>, vector<1x1x512xf32>
    %122 = vector.shape_cast %121 : vector<1x1x512xf32> to vector<1x512xf32>
    %123 = vector.broadcast %122 : vector<1x512xf32> to vector<16x512xf32>
    %124 = arith.mulf %120, %123 : vector<16x512xf32>
    %125 = arith.addf %116, %124 : vector<16x512xf32>
    %c7_86 = arith.constant 7 : index
    %c0_87 = arith.constant 0 : index
    %c0_88 = arith.constant 0 : index
    %126 = vector.load %arg7[%c7_86, %c0_87, %c0_88] : memref<9x16x32xf32, #tpu.memory_space<vmem>>, vector<1x16x32xf32>
    %127 = vector.shape_cast %126 : vector<1x16x32xf32> to vector<16x32xf32>
    %cst_89 = arith.constant dense<0.000000e+00> : vector<16x512xf32>
    %128 = tpu.matmul %127, %64, %cst_89 {dimension_numbers = #tpu.dot_dimension_numbers<[1], [0], [0], [1], [0, 0, 1, 1], [], []>} : vector<16x32xf32>, vector<32x512xf32>, vector<16x512xf32> -> vector<16x512xf32>
    %c496_i32_90 = arith.constant 496 : i32
    %129 = tpu.dynamic_rotate %128 by %c496_i32_90 dim 1 : vector<16x512xf32>, i32 -> vector<16x512xf32>
    %c7_91 = arith.constant 7 : index
    %c0_92 = arith.constant 0 : index
    %c0_93 = arith.constant 0 : index
    %130 = vector.load %arg2[%c7_91, %c0_92, %c0_93] : memref<9x1x512xf32, #tpu.memory_space<vmem>>, vector<1x1x512xf32>
    %131 = vector.shape_cast %130 : vector<1x1x512xf32> to vector<1x512xf32>
    %132 = vector.broadcast %131 : vector<1x512xf32> to vector<16x512xf32>
    %133 = arith.mulf %129, %132 : vector<16x512xf32>
    %134 = arith.addf %125, %133 : vector<16x512xf32>
    %c8_94 = arith.constant 8 : index
    %c0_95 = arith.constant 0 : index
    %c0_96 = arith.constant 0 : index
    %135 = vector.load %arg7[%c8_94, %c0_95, %c0_96] : memref<9x16x32xf32, #tpu.memory_space<vmem>>, vector<1x16x32xf32>
    %136 = vector.shape_cast %135 : vector<1x16x32xf32> to vector<16x32xf32>
    %cst_97 = arith.constant dense<0.000000e+00> : vector<16x512xf32>
    %137 = tpu.matmul %136, %64, %cst_97 {dimension_numbers = #tpu.dot_dimension_numbers<[1], [0], [0], [1], [0, 0, 1, 1], [], []>} : vector<16x32xf32>, vector<32x512xf32>, vector<16x512xf32> -> vector<16x512xf32>
    %c495_i32_98 = arith.constant 495 : i32
    %138 = tpu.dynamic_rotate %137 by %c495_i32_98 dim 1 : vector<16x512xf32>, i32 -> vector<16x512xf32>
    %c8_99 = arith.constant 8 : index
    %c0_100 = arith.constant 0 : index
    %c0_101 = arith.constant 0 : index
    %139 = vector.load %arg2[%c8_99, %c0_100, %c0_101] : memref<9x1x512xf32, #tpu.memory_space<vmem>>, vector<1x1x512xf32>
    %140 = vector.shape_cast %139 : vector<1x1x512xf32> to vector<1x512xf32>
    %141 = vector.broadcast %140 : vector<1x512xf32> to vector<16x512xf32>
    %142 = arith.mulf %138, %141 : vector<16x512xf32>
    %143 = arith.addf %134, %142 : vector<16x512xf32>
    %144 = vector.extract_strided_slice %65 {offsets = [0, 1], sizes = [8, 1], strides = [1, 1]} : vector<16x2xf32> to vector<8x1xf32>
    %145 = vector.extract_strided_slice %143 {offsets = [0, 0], sizes = [8, 512], strides = [1, 1]} : vector<16x512xf32> to vector<8x512xf32>
    %146 = math.tanh %145 : vector<8x512xf32>
    %147 = vector.broadcast %144 : vector<8x1xf32> to vector<8x512xf32>
    %148 = arith.mulf %147, %146 : vector<8x512xf32>
    %149 = vector.extract_strided_slice %143 {offsets = [8, 0], sizes = [8, 512], strides = [1, 1]} : vector<16x512xf32> to vector<8x512xf32>
    %150 = arith.addf %3, %149 : vector<8x512xf32>
    %151 = math.exp %148 : vector<8x512xf32>
    %152 = arith.mulf %150, %151 : vector<8x512xf32>
    %c0_102 = arith.constant 0 : index
    %c0_103 = arith.constant 0 : index
    %153 = vector.load %arg9[%c0_102, %c0_103] : memref<16x512xf32, #tpu.memory_space<vmem>>, vector<8x512xf32>
    tpu.vector_store %arg9[%c0_102, %c0_103], %152 {strides = array<i32>} : memref<16x512xf32, #tpu.memory_space<vmem>>, vector<8x512xf32>,
    %154 = vector.extract_strided_slice %148 {offsets = [0, 0], sizes = [8, 256], strides = [1, 1]} : vector<8x512xf32> to vector<8x256xf32>
    %155 = vector.shape_cast %154 : vector<8x256xf32> to vector<1x8x256xf32>
    %cst_104 = arith.constant dense<0.000000e+00> : vector<1xf32>
    %156 = vector.multi_reduction <add>, %155, %cst_104 [1, 2] : vector<1x8x256xf32> to vector<1xf32>
    %157 = vector.shape_cast %156 : vector<1xf32> to vector<1x1x1xf32>
    %158 = vector.extract %157[0, 0, 0] : f32 from vector<1x1x1xf32>
    %159 = vector.broadcast %158 : f32 to vector<1x1x128xf32>
    %c0_105 = arith.constant 0 : index
    %c0_106 = arith.constant 0 : index
    %c0_107 = arith.constant 0 : index
    %160 = vector.load %arg10[%c0_105, %c0_106, %c0_107] : memref<1x2x128xf32, #tpu.memory_space<vmem>>, vector<1x1x128xf32>
    tpu.vector_store %arg10[%c0_105, %c0_106, %c0_107], %159 {strides = array<i32>} : memref<1x2x128xf32, #tpu.memory_space<vmem>>, vector<1x1x128xf32>,
    %161 = vector.extract_strided_slice %148 {offsets = [0, 256], sizes = [8, 256], strides = [1, 1]} : vector<8x512xf32> to vector<8x256xf32>
    %162 = vector.shape_cast %161 : vector<8x256xf32> to vector<1x8x256xf32>
    %cst_108 = arith.constant dense<0.000000e+00> : vector<1xf32>
    %163 = vector.multi_reduction <add>, %162, %cst_108 [1, 2] : vector<1x8x256xf32> to vector<1xf32>
    %164 = vector.shape_cast %163 : vector<1xf32> to vector<1x1x1xf32>
    %165 = vector.extract %164[0, 0, 0] : f32 from vector<1x1x1xf32>
    %166 = vector.broadcast %165 : f32 to vector<1x1x128xf32>
    %c0_109 = arith.constant 0 : index
    %c1_110 = arith.constant 1 : index
    %c0_111 = arith.constant 0 : index
    %167 = vector.load %arg10[%c0_109, %c1_110, %c0_111] : memref<1x2x128xf32, #tpu.memory_space<vmem>>, vector<1x1x128xf32>
    tpu.vector_store %arg10[%c0_109, %c1_110, %c0_111], %166 {strides = array<i32>} : memref<1x2x128xf32, #tpu.memory_space<vmem>>, vector<1x1x128xf32>,
    return
  }
  func.func @transform_0(%arg0: i32) -> (i32, i32) {
    %c0_i32 = arith.constant 0 : i32
    %c0_i32_0 = arith.constant 0 : i32
    return %c0_i32, %arg0 : i32, i32
  }
  func.func @transform_1(%arg0: i32) -> (i32, i32, i32) {
    %c0_i32 = arith.constant 0 : i32
    %c0_i32_0 = arith.constant 0 : i32
    %c0_i32_1 = arith.constant 0 : i32
    %c0_i32_2 = arith.constant 0 : i32
    return %c0_i32, %c0_i32_0, %c0_i32_1 : i32, i32, i32
  }
  func.func @transform_2(%arg0: i32) -> (i32, i32) {
    %c0_i32 = arith.constant 0 : i32
    %c0_i32_0 = arith.constant 0 : i32
    %c0_i32_1 = arith.constant 0 : i32
    return %c0_i32, %c0_i32_0 : i32, i32
  }
  func.func @transform_3(%arg0: i32) -> (i32, i32) {
    %c0_i32 = arith.constant 0 : i32
    %c0_i32_0 = arith.constant 0 : i32
    %c0_i32_1 = arith.constant 0 : i32
    return %c0_i32, %c0_i32_0 : i32, i32
  }
  func.func @transform_4(%arg0: i32) -> (i32, i32) {
    %c0_i32 = arith.constant 0 : i32
    %c0_i32_0 = arith.constant 0 : i32
    %c0_i32_1 = arith.constant 0 : i32
    return %c0_i32, %c0_i32_0 : i32, i32
  }
  func.func @transform_5(%arg0: i32) -> (i32, i32) {
    %c0_i32 = arith.constant 0 : i32
    %c0_i32_0 = arith.constant 0 : i32
    %c0_i32_1 = arith.constant 0 : i32
    return %c0_i32, %c0_i32_0 : i32, i32
  }
  func.func @transform_6(%arg0: i32) -> (i32, i32, i32) {
    %c0_i32 = arith.constant 0 : i32
    %c0_i32_0 = arith.constant 0 : i32
    %c0_i32_1 = arith.constant 0 : i32
    %c0_i32_2 = arith.constant 0 : i32
    return %c0_i32, %c0_i32_0, %c0_i32_1 : i32, i32, i32
  }
  func.func @transform_7(%arg0: i32) -> (i32, i32) {
    %c0_i32 = arith.constant 0 : i32
    %c0_i32_0 = arith.constant 0 : i32
    %c0_i32_1 = arith.constant 0 : i32
    return %c0_i32, %c0_i32_0 : i32, i32
  }
  func.func @transform_8(%arg0: i32) -> (i32, i32) {
    %c0_i32 = arith.constant 0 : i32
    %c0_i32_0 = arith.constant 0 : i32
    return %c0_i32, %arg0 : i32, i32
  }
  func.func @transform_9(%arg0: i32) -> (i32, i32, i32) {
    %c0_i32 = arith.constant 0 : i32
    %c0_i32_0 = arith.constant 0 : i32
    %c0_i32_1 = arith.constant 0 : i32
    return %arg0, %c0_i32, %c0_i32_0 : i32, i32, i32
  }
}

</mosaic_0001>

<bundles_post_ra>
// kernel: squeeze.3
= control target key start
LH: loop header
LB: loop body
LE: loop exit
PB: predicated region body
PF: predicated region fallthrough
CT: control target
= control target key end

     0   :  { %vm7_vm0 = vcmask 15360   ;;  %vm13_vm1 = vcmask 31760   ;;  %s39_s0 = inlined_call_operand.vmem [shape: f32[2,2], index: 0, kind: input, shape index: {}]   ;;  %s40_s1 = inlined_call_operand.vmem [shape: f32[4], index: 1, kind: output, shape index: {}]  }
   0x1   :  { %v4_v0 = vld [vmem:[%s39_s0] sm:$0x3]  ;;  %s22_s0 = smov 2  }
   0x2   :  { %5 = vst [vmem:[#allocation1] sm:$0x3] %v4_v0 }
   0x9   :  { %v10_v1 = vld [vmem:[#allocation1 + $0x1] sm:$0x1]   ;;  %v6_v2 = vld [vmem:[#allocation1] sm:$0x1]  }
   0xa   :  { %11 = vrot.lane.b32.xlu0 %v10_v1, %s22_s0  ;;  %8 = vst.msk [vmem:[#allocation0] sm:$0x1] %vm7_vm0, %v6_v2  }
  0x7c   :  { %v12_v3 = vpop.permute.xlu0 %11  }
  0x7d   :  { %14 = vst.msk [vmem:[#allocation0] sm:$0x1] %vm13_vm1, %v12_v3  }
  0x84   :  { %v18_v4 = vld [vmem:[#allocation0] sm:$0x1] }
  0x85   :  { %20 = vst [vmem:[%s40_s1] sm:$0x1] %v18_v4 }

// kernel: custom-call.2
= control target key start
LH: loop header
LB: loop body
LE: loop exit
PB: predicated region body
PF: predicated region fallthrough
CT: control target
= control target key end

     0   :  { %5 = vsyncpa [#allocation6], 0  ;;  %s562_s0 = inlined_call_operand.vmem [shape: f32[4,4], index: 0, kind: input, shape index: {}]   ;;  %s563_s1 = inlined_call_operand.vmem [shape: f32[4,4], index: 1, kind: output, shape index: {0}]   ;;  %s564_s2 = inlined_call_operand.hbm [shape: s32[4], index: 2, kind: output, shape index: {1}]   ;;  %s565_s3 = inlined_call_operand.hbm [shape: s32[4], index: 3, kind: output, shape index: {2}]  }
   0x1   :  { %6 = vsyncpa [#allocation9], 0  ;;  %v67_v0 = vld [vmem:[%s562_s0] sm:$0xf]  ;;  %v76_v1 = vlaneseq  ;;  %v473_v2 = vmov 0   ;;  %s503_s14 = smov 0  }
   0x2   :  { %68 = vst [vmem:[#allocation1] sm:$0xf] %v67_v0  ;;  %75 = vst [vmem:[#allocation4] sm:$0x1] %v473_v2 }
   0x3   :  { %v500_v3 = vshrl.u32 %v76_v1, 7 }
   0x5   :  { %80 = vst [vmem:[#allocation10] sm:$0xff] %v500_v3 }
   0x9   :  { %v71_v4 = vld [vmem:[#allocation1] sm:$0xf] }
   0xa   :  { %72 = vst [vmem:[#allocation0] sm:$0xf] %v71_v4 }
  0x11   :  { %v73_v5 = vld [vmem:[#allocation0] sm:$0xff] }
  0x12   :  { %74 = vst [vmem:[#allocation2] sm:$0xff] %v73_v5 }
  0x13 LB: > { %vm96_vm0 = vcmp.lt.s32.totalorder %v500_v3, 4  ;;  %v510_v8 = vstv %s471_s14  ;;  %s137_s0 = ssub.s32 128, %s471_s14  ;;  %v143_v38 = vand.u32 127, %v76_v1  ;;  %v146_v40 = vld [vmem:[#allocation4] ss:$0 sm:$0xff]  ;;  %s149_s15 = scalar_lea.vmem [#allocation2], %s471_s14  ;;  %s471_s14 = sphi %s503_s14, %s86_s14  }
  0x14   : > { %vm95_vm1 = vcmp.ge.s32.totalorder %v500_v3, %v510_v8  ;;  %s155_s17 = scalar_lea.vmem [#allocation10], %s471_s14  ;;  %vm175_vm15 = vcmp.gt.s32.totalorder %v500_v3, %v510_v8  ;;  %s86_s14 = sadd.s32 1, %s471_s14  }
  0x15   : > { %vm97_vm3 = vmand %vm95_vm1, %vm96_vm0  ;;  %vm167_vm12 = vcmp.gt.s32.totalorder %v143_v38, %v510_v8  ;;  %vm144_vm13 = vcmp.eq.s32.totalorder %v143_v38, %v510_v8  ;;  %v157_v42 = vld [vmem:[%s155_s17] ss:$0 sm:$0xff]  ;;  %p83_p0 = scmp.ge.s32.totalorder %s86_s14, 4  }
  0x16   : > { %vm179_vm1 = vmand %vm175_vm15, %vm144_vm13  ;;  %s474_s20 = smov (%p83_p0), [#allocation5]  }
  0x17   :  { %s320_s21 = sshll.u32 (%p83_p0), %s474_s20, 4  ;;  %s321_s21 = int_to_ptr.vmem [resolvable:$true] %s320_s21 }
  0x18   :  { %s417_s22 = scalar_lea.vmem (%p83_p0), %s321_s21, 16  ;;  %s421_s23 = scalar_lea.vmem (%p83_p0), %s321_s21, 32 }
  0x19   : > { %v91_v6 = vld [vmem:[#allocation2] sm:$0xff]  ;;  %v151_v41 = vld [vmem:[%s149_s15] ss:$0 sm:$0xff]  ;;  %p418_p1 = scmp.ne.s32.totalorder (%p83_p0), %s321_s21, %s417_s22  ;;  %p422_p2 = scmp.lt.s32.totalorder (%p83_p0), %s321_s21, %s321_s21 }
  0x1a   : > { %v92_v7 = vand.u32 2147483647, %v91_v6  ;;  %p423_p3 = scmp.lt.s32.totalorder (%p83_p0), %s421_s23, %s417_s22 }
  0x1c   : > { %vm398_vm2 = vcmp.gt.f32.partialorder %v92_v7, -inf  ;;  %p424_p4 = por (%p83_p0), %p423_p3, %p422_p2 }
  0x1d   : > { %vm99_vm4 = vmand %vm97_vm3, %vm398_vm2 }
  0x1e   : > { %v100_v9 = vsel %vm99_vm4, %v500_v3, %v510_v8  ;;  %v101_v10 = vsel %vm99_vm4, %v92_v7, -inf  ;;  %p425_p5 = pnand (%p83_p0), %p424_p4, %p418_p1 }
  0x1f   : > { %v102_v11 = vrot.slane %v101_v10, 1  ;;  %v103_v12 = vrot.slane %v100_v9, 1 }
  0x21   : > { %vm104_vm5 = vcmp.ge.f32.partialorder %v102_v11, %v101_v10  ;;  %v107_v13 = vrot.slane %v102_v11, 1  ;;  %v108_v14 = vrot.slane %v103_v12, 1 }
  0x22   : > { %v105_v15 = vsel %vm104_vm5, %v102_v11, %v101_v10  ;;  %v106_v16 = vsel %vm104_vm5, %v103_v12, %v100_v9 }
  0x23   : > { %vm109_vm6 = vcmp.ge.f32.partialorder %v107_v13, %v105_v15  ;;  %v112_v17 = vrot.slane %v107_v13, 1  ;;  %v113_v18 = vrot.slane %v108_v14, 1 }
  0x24   : > { %v110_v19 = vsel %vm109_vm6, %v107_v13, %v105_v15  ;;  %v111_v20 = vsel %vm109_vm6, %v108_v14, %v106_v16 }
  0x25   : > { %vm114_vm7 = vcmp.ge.f32.partialorder %v112_v17, %v110_v19  ;;  %v117_v21 = vrot.slane %v112_v17, 1  ;;  %v118_v22 = vrot.slane %v113_v18, 1 }
  0x26   : > { %v115_v23 = vsel %vm114_vm7, %v112_v17, %v110_v19  ;;  %v116_v24 = vsel %vm114_vm7, %v113_v18, %v111_v20 }
  0x27   : > { %vm119_vm8 = vcmp.ge.f32.partialorder %v117_v21, %v115_v23  ;;  %v122_v25 = vrot.slane %v117_v21, 1  ;;  %v123_v26 = vrot.slane %v118_v22, 1 }
  0x28   : > { %v120_v27 = vsel %vm119_vm8, %v117_v21, %v115_v23  ;;  %v121_v28 = vsel %vm119_vm8, %v118_v22, %v116_v24 }
  0x29   : > { %vm124_vm9 = vcmp.ge.f32.partialorder %v122_v25, %v120_v27  ;;  %v127_v29 = vrot.slane %v122_v25, 1  ;;  %v128_v30 = vrot.slane %v123_v26, 1 }
  0x2a   : > { %v125_v31 = vsel %vm124_vm9, %v122_v25, %v120_v27  ;;  %v126_v32 = vsel %vm124_vm9, %v123_v26, %v121_v28 }
  0x2b   : > { %vm129_vm10 = vcmp.ge.f32.partialorder %v127_v29, %v125_v31  ;;  %v132_v33 = vrot.slane %v127_v29, 1  ;;  %v133_v34 = vrot.slane %v128_v30, 1 }
  0x2c   : > { %v130_v35 = vsel %vm129_vm10, %v127_v29, %v125_v31  ;;  %v131_v36 = vsel %vm129_vm10, %v128_v30, %v126_v32 }
  0x2d   : > { %vm134_vm11 = vcmp.ge.f32.partialorder %v132_v33, %v130_v35 }
  0x2e   : > { %v136_v37 = vsel %vm134_vm11, %v133_v34, %v131_v36 }
  0x2f   : > { %138 = vrot.lane.b32.xlu0 %v136_v37, %s137_s0 }
  0xa1   : > { %v139_v39 = vpop.permute.xlu0 %138 }
  0xa2   : > { %402 = vpush %v139_v39 }
  0xd3   : > { %s403_s16 = spop %402 }
  0xd4   : > { %v145_v43 = vstv %s403_s16  ;;  %s150_s18 = scalar_lea.vmem [#allocation2], %s403_s16  ;;  %s156_s19 = scalar_lea.vmem [#allocation10], %s403_s16 }
  0xd5   : > { %v152_v44 = vld [vmem:[%s150_s18] ss:$0 sm:$0xff]  ;;  %v147_v46 = vsel %vm144_vm13, %v145_v43, %v146_v40 }
  0xd6   : > { %v158_v45 = vld [vmem:[%s156_s19] ss:$0 sm:$0xff]  ;;  %153 = vst [vmem:[%s150_s18] sm:$0x1] %v151_v41  ;;  %vm161_vm14 = vcmp.ne.f32.partialorder %v152_v44, 0.0  ;;  %148 = vst [vmem:[#allocation4] sm:$0x1] %v147_v46 }
  0xd7   : > { %159 = vst [vmem:[%s156_s19] sm:$0x1] %v157_v42  ;;  %154 = vst [vmem:[%s149_s15] sm:$0x1] %v152_v44  ;;  %v168_v53 = vsel %vm167_vm12, %v152_v44, 0.0 }
  0xd8   : > { %160 = vst [vmem:[%s155_s17] sm:$0x1] %v158_v45  ;;  %vm162_vm0 = vmand %vm144_vm13, %vm161_vm14 }
  0xd9   : > { %v163_v47 = vsel %vm162_vm0, %v152_v44, 1.0 }
  0xda   : > { %v176_v48 = vsel %vm175_vm15, %v163_v47, 1.0 }
  0xdb   : > { %415 = vrcp.f32 %v176_v48 }
  0xdd   :  { %v244_v59 = vld [vmem:[#allocation4] sm:$0x1] (%p83_p0) }
  0xde   : > { %v172_v50 = vld [vmem:[#allocation2] sm:$0xff]  ;;  %246 = vst [vmem:[#allocation5] sm:$0x1] (%p83_p0), %v244_v59 }
  0xdf   :  { %v186_v57 = vld [vmem:[#allocation10] sm:$0xff] (%p83_p0) }
  0xe5   : > { %v416_v49 = vpop.eup %415 }
  0xe6   : > { %v178_v51 = vmul.f32 %v416_v49, %v172_v50 }
  0xe8   : > { %v180_v52 = vsel %vm179_vm1, %v178_v51, 0.0 }
  0xe9   : > { %181 = vadd.xlane.f32.xlu0 %v180_v52 }
 0x116   :  { %202 = vxpose.xlu0.b32.start.end [1/1] (short) (narrow) (%p83_p0), %v186_v57, 8 }
 0x175   :  { %85 = sbr.rel (!%p83_p0) target bundleno = 19 (0x13), region = 134 }
 0x176   : > { %v182_v54 = vpop.xlane.xlu0 %181 }
 0x177   : > { %v183_v55 = vmul.f32 %v182_v54, %v168_v53 }
 0x179   : > { %v184_v56 = vsub.f32 %v178_v51, %v183_v55 }
 0x17b   : > { %185 = vst [vmem:[#allocation2] sm:$0xff] %v184_v56 }
 0x182   :  { %v238_v58 = vld [vmem:[#allocation2] sm:$0xf] }
 0x183   :  { %240 = vst [vmem:[#allocation3] sm:$0xf] %v238_v58 }
 0x184   :  { %428 = shalt.err (!%p425_p5)
}
 0x185   :  { %s429_s26 = scalar_lea.hbm %s564_s2, 16 }
 0x186   :  { %p430_p6 = scmp.ne.s32.totalorder %s564_s2, %s429_s26  ;;  %p433_p7 = scmp.lt.u32.totalorder %s429_s26, %s564_s2 }
 0x188   :  { %p435_p8 = pnand %p433_p7, %p430_p6 }
 0x18a   :  { %438 = shalt.err (!%p435_p8)
}
 0x18b   :  { %323 = dma.vmem_to_hbm [thread:$0]  %s321_s21, 16, %s564_s2, [#allocation6]   ;;  %v313_v60 = vld [vmem:[#allocation3] sm:$0xf] }
 0x18c   :  { %314 = vst [vmem:[%s563_s1] sm:$0xf] %v313_v60  ;;  %s475_s8 = smov [#allocation8]  }
 0x18d   :  { %s329_s9 = sshll.u32 %s475_s8, 4  ;;  %s330_s9 = int_to_ptr.vmem [resolvable:$true] %s329_s9 }
 0x18e   :  { %s439_s10 = scalar_lea.vmem %s330_s9, 16  ;;  %s443_s11 = scalar_lea.vmem %s330_s9, 32 }
 0x18f   :  { %p440_p9 = scmp.ne.s32.totalorder %s330_s9, %s439_s10  ;;  %p444_p10 = scmp.lt.s32.totalorder %s330_s9, %s330_s9 }
 0x190   :  { %p445_p11 = scmp.lt.s32.totalorder %s443_s11, %s439_s10 }
 0x192   :  { %p446_p12 = por %p445_p11, %p444_p10 }
 0x194   :  { %p447_p13 = pnand %p446_p12, %p440_p9 }
 0x196   :  { %v218_v61 = vpop.trf.xlu0 }
 0x197   :  { %234 = vst [vmem:[#allocation7] sm:$0x1] %v218_v61 }
 0x19e   :  { %v250_v62 = vld [vmem:[#allocation7] sm:$0x1] }
 0x19f   :  { %252 = vst [vmem:[#allocation8] sm:$0x1] %v250_v62 }
 0x1a0   :  { %450 = shalt.err (!%p447_p13)
}
 0x1a1   :  { %s451_s13 = scalar_lea.hbm %s565_s3, 16 }
 0x1a2   :  { %p452_p0 = scmp.ne.s32.totalorder %s565_s3, %s451_s13  ;;  %p455_p1 = scmp.lt.u32.totalorder %s451_s13, %s565_s3 }
 0x1a4   :  { %p457_p2 = pnand %p455_p1, %p452_p0 }
 0x1a6   :  { %460 = shalt.err (!%p457_p2)
}
 0x1a7   :  { %332 = dma.vmem_to_hbm [thread:$0]  %s330_s9, 16, %s565_s3, [#allocation9]  }
 0x1a8   :  { %465 = dma.done.wait [#allocation6], 16  }
 0x1a9   :  { %466 = vsyncadd [#allocation6], 4294967280 }
 0x1aa   :  { %467 = dma.done.wait [#allocation9], 16  }
 0x1ab   :  { %468 = vsyncadd [#allocation9], 4294967280 }
 0x1ac   :  { %339 = vsyncpa [#allocation6], 1 }
 0x1ad   :  { %340 = vsyncpa [#allocation9], 1 }

// kernel: flow_step.1
= control target key start
LH: loop header
LB: loop body
LE: loop exit
PB: predicated region body
PF: predicated region fallthrough
CT: control target
= control target key end

     0   :  { %s3775_s30 = smov 0   ;;  %s3777_s10 = smov 0   ;;  %s4950_s0 = inlined_call_operand.vmem [shape: f32[5,1024], index: 0, kind: input, shape index: {}]   ;;  %s4951_s1 = inlined_call_operand.vmem [shape: f32[9,1,512], index: 1, kind: input, shape index: {}]   ;;  %s4952_s2 = inlined_call_operand.vmem [shape: f32[24,5], index: 2, kind: input, shape index: {}]   ;;  %s4953_s3 = inlined_call_operand.vmem [shape: f32[32,72], index: 3, kind: input, shape index: {}]   ;;  %s4954_s4 = inlined_call_operand.vmem [shape: f32[32,2], index: 4, kind: input, shape index: {}]   ;;  %s4955_s5 = inlined_call_operand.vmem [shape: f32[32,32], index: 5, kind: input, shape index: {}]   ;;  %s4956_s6 = inlined_call_operand.vmem [shape: f32[9,16,32], index: 6, kind: input, shape index: {}]   ;;  %s4957_s7 = inlined_call_operand.vmem [shape: f32[16,2], index: 7, kind: input, shape index: {}]   ;;  %s4958_s8 = inlined_call_operand.vmem [shape: f32[16,1024], index: 8, kind: output, shape index: {0}]   ;;  %s4959_s9 = inlined_call_operand.vmem [shape: f32[2,2,128], index: 9, kind: output, shape index: {1}]  }
   0x1   :  { %s3779_s11 = smov 0  }
   0x2 LB: > { %s3788_s12 = sadd.s32 4294967295, %s3712_s11   ;;  %s3790_s13 = sadd.s32 1, %s3712_s11   ;;  %s3712_s11 = sphi %s3779_s11, %s5061_s11   ;;  %s3708_s10 = sphi %s3777_s10, %s5060_s10   ;;  %s3704_s30 = sphi %s3775_s30, %s5059_s30  }
   0x3   : > { %s197_s14 = ssub.s32 %s3712_s11, %s3790_s13  ;;  %s200_s15 = sadd.s32 1, %s3708_s10 }
   0x4   : > { %p198_p0 = scmp.eq.s32.totalorder %s197_s14, 0  ;;  %p210_p1 = scmp.ne.s32.totalorder %s3708_s10, %s3704_s30 }
   0x5   : > { %p211_p2 = scmp.eq.s32.totalorder %s3788_s12, 1  ;;  %p3316_p3 = scmp.ge.s32.totalorder %s3712_s11, 1 }
   0x6   : > { %s3798_s16 = scalar_select %p198_p0, %s3708_s10, %s200_s15  }
   0x7   : > { %p3800_p4 = por %p211_p2, %p210_p1  ;;  %p291_p5 = scmp.lt.s32.totalorder %s3712_s11, 3 }
   0x9   : > { %p292_p6 = pnand %p3316_p3, %p291_p5 }
   0xb   : > { %295 = sbr.rel (%p292_p6) target bundleno = 1522 (0x5f2), region = 52 }
  0x12   : > { %s3318_s18 = sshll.u32 %s3788_s12, 2  ;;  %v4962_v0 = vmov 0.0   ;;  %vm358_vm0 = vcmask 1044480   ;;  %v345_v1 = vld [vmem:[%s4952_s2] sm:$0xff]  ;;  %vm348_vm1 = vcmask 39936   ;;  %v346_v6 = vld [vmem:[%s4952_s2 + $0x8] sm:$0xff]  ;;  %v553_v25 = vlaneseq }
  0x13   : > { %p331_p7 = scmp.lt.s32.totalorder %s3318_s18, 7  ;;  %435 = vmatprep.mubr.f32.mxu0 %v4962_v0  ;;  %518 = vmatprep.mubr.f32.mxu1 %v4962_v0  ;;  %v347_v7 = vld [vmem:[%s4952_s2 + $0x10] sm:$0xff]  ;;  %s321_s29 = sand.u32 1, %s3704_s30   ;;  %v3913_v20 = vld [vmem:[%s4954_s4] sm:$0xff]  ;;  %v3918_v21 = vld [vmem:[%s4954_s4 + $0x8] sm:$0xff]  ;;  %v4960_v22 = vmov 0  }
  0x14   : > { %s3317_s11 = sshll.u32 %s321_s29, 6  ;;  %s3715_s30 = smov 17   ;;  %3667 = vset.pattern.permute.xlu0 %v4960_v22  ;;  %3668 = vset.pattern.permute.xlu1 %v4960_v22  ;;  %v3927_v23 = vld [vmem:[%s4954_s4 + $0x10] sm:$0xff]  ;;  %v3932_v24 = vld [vmem:[%s4954_s4 + $0x18] sm:$0xff]  ;;  %v563_v28 = vshrl.u32 %v553_v25, 7  ;;  %v3940_v29 = vand.u32 127, %v553_v25 }
  0x15   : > { %s5063_s18 = smov (!%p331_p7, %s3318_s18), 7  ;;  %s3832_s14 = scalar_lea.vmem [#allocation2], %s3317_s11  ;;  %v3947_v33 = vld [vmem:[%s4951_s1] sm:$0xf]  ;;  %v3331_v36 = vld [vmem:[%s4951_s1 + $0x4] sm:$0xf] }
  0x16   : > { %s3319_s19 = sshll.u32 %s5063_s18, 3  ;;  %s3716_s15 = smov 16   ;;  %v3942_v32 = vsub.s32 3, %v563_v28  ;;  %vm555_vm2 = vcmp.lt.s32.totalorder %v3940_v29, 17  ;;  %vm594_vm3 = vcmp.lt.s32.totalorder %v3940_v29, 16  ;;  %v3972_v52 = vsub.s32 0, %v563_v28 }
  0x17   : > { %s334_s22 = scalar_lea.vmem %s4950_s0, %s3319_s19  ;;  %s3717_s18 = smov 15   ;;  %v3974_v53 = vsub.s32 1, %v563_v28  ;;  %v3976_v54 = vsub.s32 2, %v563_v28  ;;  %v3332_v57 = vld [vmem:[%s4951_s1 + $0x8] sm:$0xf]  ;;  %vm634_vm4 = vcmp.lt.s32.totalorder %v3940_v29, 15 }
  0x18   : > { %v342_v2 = vld [vmem:[%s334_s22 + $0x8] sm:$0x1f]  ;;  %v344_v3 = vld [vmem:[%s334_s22 + $0x18] sm:$0x1f]  ;;  %v341_v4 = vld [vmem:[%s334_s22] sm:$0x1f]  ;;  %v3955_v37 = vrot.slane %v3947_v33, %v3942_v32  ;;  %v3958_v38 = vrot.slane %v3331_v36, %v3942_v32  ;;  %v3985_v58 = vrot.slane %v3947_v33, %v3972_v52  ;;  %v3988_v59 = vrot.slane %v3331_v36, %v3972_v52 }
  0x19   : > { %3321 = vmatprep.subr.msk.mxu0 %vm358_vm0, %v342_v2  ;;  %3326 = vmatprep.subr.msk.mxu1 %vm358_vm0, %v344_v3  ;;  %v343_v5 = vld [vmem:[%s334_s22 + $0x10] sm:$0x1f]  ;;  %s3718_s19 = smov 1   ;;  %s3719_s20 = smov 127   ;;  %v3333_v60 = vld [vmem:[%s4951_s1 + $0xc] sm:$0xf]  ;;  %v3994_v61 = vrot.slane %v3331_v36, %v3974_v53  ;;  %v3997_v62 = vrot.slane %v3331_v36, %v3976_v54  ;;  %v4003_v3 = vrot.slane %v3332_v57, %v3974_v53 }
  0x1a   : > { %3322 = vmatpush1.msk.msra.mxu0 %vm358_vm0, %v341_v4  ;;  %3327 = vmatpush1.msk.msra.mxu1 %vm358_vm0, %v343_v5  ;;  %s3720_s21 = smov 113   ;;  %s3721_s22 = smov 112   ;;  %4981 = vst [vmem:[#allocation3_spill] sm:$0xff] %v3955_v37  ;;  %4982 = vst [vmem:[#allocation4_spill] sm:$0xff] %v3958_v38  ;;  %v4006_v4 = vrot.slane %v3332_v57, %v3976_v54  ;;  %v4009_v5 = vrot.slane %v3332_v57, %v3972_v52  ;;  %vm674_vm5 = vcmp.lt.s32.totalorder %v3940_v29, 1  ;;  %vm894_vm10 = vcmask 588800  }
  0x1b   : > { %3323 = vmatmul.mubr.msk.f32.vlgmr.msra.gmra.mrb[0].mxu0 %vm348_vm1, %v345_v1  ;;  %3328 = vmatmul.mubr.msk.f32.vlgmr.msra.gmra.mrb[0].mxu1 %vm348_vm1, %v345_v1  ;;  %s3722_s23 = smov 111   ;;  %4983 = vst [vmem:[#allocation5_spill] sm:$0xff] %v3985_v58  ;;  %4984 = vst [vmem:[#allocation6_spill] sm:$0xff] %v3988_v59  ;;  %vm714_vm6 = vcmp.lt.s32.totalorder %v3940_v29, 127  ;;  %vm754_vm7 = vcmp.lt.s32.totalorder %v3940_v29, 113  ;;  %vm794_vm8 = vcmp.lt.s32.totalorder %v3940_v29, 112 }
  0x1c   : > { %441 = vmatprep.mubr.f32.mxu0 %v4962_v0  ;;  %524 = vmatprep.mubr.f32.mxu1 %v4962_v0  ;;  %4985 = vst [vmem:[#allocation7_spill] sm:$0xff] %v3994_v61  ;;  %4986 = vst [vmem:[#allocation8_spill] sm:$0xff] %v4003_v3  ;;  %vm834_vm9 = vcmp.lt.s32.totalorder %v3940_v29, 111  ;;  %vm1121_vm11 = vcmask 261120   ;;  %p337_p8 = scmp.lt.s32.totalorder %s3788_s12, 1 }
  0x1d   : > { %4987 = vst [vmem:[#allocation9_spill] sm:$0xff] %v4006_v4 }
  0x1f   : > { %3324 = vmatmul.mubr.msk.f32.gmra.mrb[2].mxu0 %vm348_vm1, %v346_v6  ;;  %3329 = vmatmul.mubr.msk.f32.gmra.mrb[2].mxu1 %vm348_vm1, %v346_v6  ;;  %v4012_v6 = vrot.slane %v3332_v57, %v3942_v32 }
  0x20   : > { %447 = vmatprep.mubr.f32.mxu0 %v4962_v0  ;;  %530 = vmatprep.mubr.f32.mxu1 %v4962_v0 }
  0x23   : > { %3325 = vmatmul.mubr.msk.f32.gmra.mrb[4].mxu0 %vm348_vm1, %v347_v7  ;;  %3330 = vmatmul.mubr.msk.f32.gmra.mrb[4].mxu1 %vm348_vm1, %v347_v7  ;;  %v3334_v7 = vld [vmem:[%s4951_s1 + $0x14] sm:$0xf] }
  0x24   : > { %971 = vmatprep.mubr.f32.mxu0 %v4962_v0  ;;  %1060 = vmatprep.mubr.f32.mxu1 %v4962_v0  ;;  %v4040_v25 = vrot.slane %v3334_v7, %v3972_v52  ;;  %v4043_v28 = vrot.slane %v3334_v7, %v3974_v53 }
  0xf2   : > { %v443_v8 = vpop.f32.mrb[2].mxu0  ;;  %v526_v9 = vpop.f32.mrb[2].mxu1 }
  0xf3   : > { %537 = vst [vmem:[%s3832_s14 + $0x20] sm:$0xff] %v443_v8  ;;  %v445_v10 = vpop.f32.mrb[3].mxu0  ;;  %539 = vst [vmem:[%s3832_s14 + $0x30] sm:$0xff] %v526_v9  ;;  %v528_v11 = vpop.f32.mrb[3].mxu1  ;;  %v4022_v9 = vrot.slane %v3333_v60, %v3974_v53 }
  0xf4   : > { %538 = vst [vmem:[%s3832_s14 + $0x28] sm:$0xff] %v445_v10  ;;  %540 = vst [vmem:[%s3832_s14 + $0x38] sm:$0xff] %v528_v11  ;;  %v4025_v10 = vrot.slane %v3333_v60, %v3976_v54 }
  0xf5   : > { %4988 = vst [vmem:[#allocation10_spill] sm:$0xff] %v4022_v9 }
  0xf6   : > { %v449_v12 = vpop.f32.mrb[4].mxu0  ;;  %v532_v13 = vpop.f32.mrb[4].mxu1  ;;  %4989 = vst [vmem:[#allocation11_spill] sm:$0xff] %v4025_v10 }
  0xf7   : > { %v3838_v14 = vmax.f32 %v449_v12, 0.0  ;;  %v3840_v15 = vmax.f32 %v532_v13, 0.0  ;;  %v451_v16 = vpop.f32.mrb[5].mxu0  ;;  %v534_v17 = vpop.f32.mrb[5].mxu1  ;;  %v4029_v12 = vrot.slane %v3333_v60, %v3972_v52  ;;  %v4032_v13 = vrot.slane %v3333_v60, %v3942_v32 }
  0xf8   : > { %v3846_v18 = vmax.f32 %v534_v17, 0.0  ;;  %v3852_v19 = vmax.f32 %v451_v16, 0.0 }
  0xf9   : > { %549 = vrot.lane.b32.xlu1 %v3840_v15, %s3715_s30  ;;  %545 = vrot.lane.b32.xlu0 %v3838_v14, %s3715_s30  ;;  %4990 = vst [vmem:[#allocation12_spill] sm:$0xff] %v4032_v13 }
  0xfd   : > { %551 = vrot.lane.b32.xlu1 %v3846_v18, %s3715_s30  ;;  %586 = vrot.lane.b32.xlu0 %v3838_v14, %s3716_s15 }
 0x101   : > { %590 = vrot.lane.b32.xlu0 %v3840_v15, %s3716_s15  ;;  %588 = vrot.lane.b32.xlu1 %v3852_v19, %s3716_s15 }
 0x105   : > { %626 = vrot.lane.b32.xlu0 %v3838_v14, %s3717_s18  ;;  %592 = vrot.lane.b32.xlu1 %v3846_v18, %s3716_s15 }
 0x109   : > { %630 = vrot.lane.b32.xlu0 %v3840_v15, %s3717_s18  ;;  %628 = vrot.lane.b32.xlu1 %v3852_v19, %s3717_s18 }
 0x10d   : > { %666 = vrot.lane.b32.xlu0 %v3838_v14, %s3718_s19  ;;  %632 = vrot.lane.b32.xlu1 %v3846_v18, %s3717_s18 }
 0x111   : > { %670 = vrot.lane.b32.xlu0 %v3840_v15, %s3718_s19  ;;  %668 = vrot.lane.b32.xlu1 %v3852_v19, %s3718_s19 }
 0x115   : > { %706 = vrot.lane.b32.xlu0 %v3838_v14, %s3719_s20  ;;  %672 = vrot.lane.b32.xlu1 %v3846_v18, %s3718_s19 }
 0x119   : > { %710 = vrot.lane.b32.xlu0 %v3840_v15, %s3719_s20  ;;  %708 = vrot.lane.b32.xlu1 %v3852_v19, %s3719_s20 }
 0x11d   : > { %746 = vrot.lane.b32.xlu0 %v3838_v14, %s3720_s21  ;;  %712 = vrot.lane.b32.xlu1 %v3846_v18, %s3719_s20 }
 0x121   : > { %748 = vrot.lane.b32.xlu1 %v3852_v19, %s3720_s21  ;;  %547 = vrot.lane.b32.xlu0 %v3852_v19, %s3715_s30 }
 0x125   : > { %752 = vrot.lane.b32.xlu1 %v3846_v18, %s3720_s21  ;;  %750 = vrot.lane.b32.xlu0 %v3840_v15, %s3720_s21 }
 0x129   : > { %788 = vrot.lane.b32.xlu1 %v3852_v19, %s3721_s22  ;;  %786 = vrot.lane.b32.xlu0 %v3838_v14, %s3721_s22 }
 0x12d   : > { %792 = vrot.lane.b32.xlu1 %v3846_v18, %s3721_s22  ;;  %790 = vrot.lane.b32.xlu0 %v3840_v15, %s3721_s22 }
 0x131   : > { %828 = vrot.lane.b32.xlu1 %v3852_v19, %s3722_s23  ;;  %826 = vrot.lane.b32.xlu0 %v3838_v14, %s3722_s23 }
 0x135   : > { %832 = vrot.lane.b32.xlu1 %v3846_v18, %s3722_s23  ;;  %830 = vrot.lane.b32.xlu0 %v3840_v15, %s3722_s23 }
 0x139   : > { %876 = vperm.xlu0 %3667, %v3913_v20   ;;  %881 = vperm.xlu1 %3668, %v3918_v21  }
 0x13d   : > { %886 = vperm.xlu1 %3668, %v3927_v23   ;;  %891 = vperm.xlu0 %3667, %v3932_v24  }
 0x16b   : > { %v3936_v26 = vpop.permute.xlu1 %549  ;;  %v3938_v27 = vpop.permute.xlu0 %545 }
 0x16f   : > { %v552_v30 = vpop.permute.xlu1 %551  ;;  %v587_v31 = vpop.permute.xlu0 %586 }
 0x170   : > { %v556_v39 = vsel %vm555_vm2, %v3936_v26, %v552_v30  ;;  %v559_v8 = vsel %vm555_vm2, %v552_v30, %v3938_v27 }
 0x171   : > { %v585_v43 = vmul.f32 %v3955_v37, %v556_v39  ;;  %v582_v39 = vmul.f32 %v3985_v58, %v559_v8 }
 0x173   : > { %v591_v34 = vpop.permute.xlu0 %590  ;;  %v589_v35 = vpop.permute.xlu1 %588 }
 0x174   : > { %v596_v16 = vsel %vm594_vm3, %v589_v35, %v591_v34  ;;  %v597_v17 = vsel %vm594_vm3, %v587_v31, %v589_v35 }
 0x175   : > { %v623_v57 = vmul.f32 %v3994_v61, %v597_v17  ;;  %v624_v60 = vmul.f32 %v3997_v62, %v596_v16 }
 0x177   : > { %v3964_v40 = vpop.permute.xlu0 %626  ;;  %v593_v41 = vpop.permute.xlu1 %592 }
 0x178   : > { %v595_v42 = vsel %vm594_vm3, %v591_v34, %v593_v41  ;;  %v598_v63 = vsel %vm594_vm3, %v593_v41, %v587_v31  ;;  %v4049_v41 = vrot.slane %v3334_v7, %v3976_v54  ;;  %v4057_v31 = vld [vmem:[%s4951_s1 + $0x18] sm:$0xf]  ;;  %v4061_v34 = vrot.slane %v3947_v33, %v3974_v53 }
 0x179   : > { %v625_v44 = vmul.f32 %v3958_v38, %v595_v42  ;;  %v622_v11 = vmul.f32 %v3988_v59, %v598_v63  ;;  %v4052_v42 = vrot.slane %v3334_v7, %v3942_v32  ;;  %v4079_v7 = vrot.slane %v4057_v31, %v3974_v53 }
 0x17a   : > { %4991 = vst [vmem:[#allocation13_spill] sm:$0xff] %v4061_v34 }
 0x17b   : > { %v631_v45 = vpop.permute.xlu0 %630  ;;  %v629_v46 = vpop.permute.xlu1 %628  ;;  %v3428_v47 = vpack.c.bf16 %v625_v44, %v585_v43  ;;  %v4069_v44 = vrot.slane %v3947_v33, %v3976_v54  ;;  %v3414_v63 = vpack.c.bf16 %v622_v11, %v582_v39 }
 0x17c   : > { %v636_v8 = vsel %vm634_vm4, %v629_v46, %v631_v45  ;;  %v637_v33 = vsel %vm634_vm4, %v3964_v40, %v629_v46 }
 0x17d   : > { %3429 = vmatprep.subr.bf16.mxu1 %v3428_v47  ;;  %4992 = vst [vmem:[#allocation14_spill] sm:$0xff] %v4069_v44  ;;  %v4073_v47 = vrot.slane %v4057_v31, %v3942_v32 }
 0x17f   : > { %v667_v48 = vpop.permute.xlu0 %666  ;;  %v3970_v49 = vpop.permute.xlu1 %632 }
 0x180   : > { %v635_v22 = vsel %vm634_vm4, %v631_v45, %v3970_v49 }
 0x183   : > { %v671_v50 = vpop.permute.xlu0 %670  ;;  %v669_v51 = vpop.permute.xlu1 %668 }
 0x184   : > { %v677_v35 = vsel %vm674_vm5, %v667_v48, %v669_v51  ;;  %v676_v17 = vsel %vm674_vm5, %v669_v51, %v671_v50 }
 0x185   : > { %v703_v39 = vmul.f32 %v4022_v9, %v677_v35 }
 0x187   : > { %v3978_v55 = vpop.permute.xlu0 %706  ;;  %v673_v56 = vpop.permute.xlu1 %672 }
 0x188   : > { %v675_v43 = vsel %vm674_vm5, %v671_v50, %v673_v56  ;;  %v678_v45 = vsel %vm674_vm5, %v673_v56, %v667_v48  ;;  %v704_v56 = vmul.f32 %v4025_v10, %v676_v17  ;;  %v3336_v17 = vld [vmem:[%s4951_s1 + $0x1c] sm:$0xf]  ;;  %v664_v10 = vmul.f32 %v4006_v4, %v636_v8 }
 0x189   : > { %v705_v0 = vmul.f32 %v4032_v13, %v675_v43  ;;  %v663_v43 = vmul.f32 %v4003_v3, %v637_v33  ;;  %v702_v9 = vmul.f32 %v4029_v12, %v678_v45  ;;  %v4137_v45 = vrot.slane %v3336_v17, %v3972_v52 }
 0x18b   : > { %v711_v1 = vpop.permute.xlu0 %710  ;;  %v709_v2 = vpop.permute.xlu1 %708 }
 0x18c   : > { %v716_v48 = vsel %vm714_vm6, %v709_v2, %v711_v1 }
 0x18f   : > { %v4045_v30 = vpop.permute.xlu0 %746  ;;  %v713_v36 = vpop.permute.xlu1 %712 }
 0x190   : > { %v718_v50 = vsel %vm714_vm6, %v713_v36, %v3978_v55 }
 0x193   : > { %v749_v16 = vpop.permute.xlu1 %748  ;;  %v548_v11 = vpop.permute.xlu0 %547 }
 0x194   : > { %v557_v38 = vsel %vm555_vm2, %v548_v11, %v3936_v26  ;;  %v558_v46 = vsel %vm555_vm2, %v3938_v27, %v548_v11  ;;  %v638_v26 = vsel %vm634_vm4, %v3970_v49, %v3964_v40  ;;  %v665_v27 = vmul.f32 %v4012_v6, %v635_v22 }
 0x195   : > { %v583_v51 = vmul.f32 %v4061_v34, %v558_v46  ;;  %v584_v35 = vmul.f32 %v4069_v44, %v557_v38  ;;  %v717_v11 = vsel %vm714_vm6, %v3978_v55, %v709_v2  ;;  %v715_v40 = vsel %vm714_vm6, %v711_v1, %v713_v36 }
 0x196   : > { %v745_v22 = vmul.f32 %v4052_v42, %v718_v50  ;;  %v3432_v49 = vpack.c.bf16 %v705_v0, %v665_v27  ;;  %v743_v55 = vmul.f32 %v4043_v28, %v716_v48  ;;  %v3416_v2 = vpack.c.bf16 %v703_v39, %v663_v43 }
 0x197   : > { %v3430_v46 = vpack.c.bf16 %v624_v60, %v584_v35  ;;  %v753_v38 = vpop.permute.xlu1 %752  ;;  %v751_v13 = vpop.permute.xlu0 %750  ;;  %v3412_v33 = vpack.c.bf16 %v623_v57, %v583_v51  ;;  %v662_v57 = vmul.f32 %v4009_v5, %v638_v26  ;;  %v742_v1 = vmul.f32 %v4040_v25, %v717_v11 }
 0x198   : > { %v4132_v0 = vrot.slane %v4057_v31, %v3976_v54  ;;  %v3434_v36 = vpack.c.bf16 %v704_v56, %v664_v10  ;;  %v744_v60 = vmul.f32 %v4049_v41, %v715_v40  ;;  %v4140_v50 = vrot.slane %v3336_v17, %v3942_v32 }
 0x199   : > { %3413 = vmatprep.subr.bf16.mxu0 %v3412_v33  ;;  %3431 = vmatpush1.bf16.msra.mxu1 %v3430_v46  ;;  %v3418_v51 = vpack.c.bf16 %v702_v9, %v662_v57  ;;  %v756_v35 = vsel %vm754_vm7, %v749_v16, %v751_v13  ;;  %v3436_v10 = vpack.c.bf16 %v745_v22, %v3846_v18  ;;  %v3337_v57 = vld [vmem:[%s4951_s1 + $0x20] sm:$0xf] }
 0x19a   : > { %3415 = vmatpush1.bf16.msra.mxu0 %v3414_v63  ;;  %3433 = vmatprep.subr.bf16.mxu1 %v3432_v49  ;;  %v758_v63 = vsel %vm754_vm7, %v753_v38, %v4045_v30  ;;  %v3420_v26 = vpack.c.bf16 %v743_v55, %v3852_v19  ;;  %v4152_v27 = vrot.slane %v3336_v17, %v3974_v53 }
 0x19b   : > { %v789_v8 = vpop.permute.xlu1 %788  ;;  %3417 = vmatprep.subr.bf16.mxu0 %v3416_v2  ;;  %v787_v39 = vpop.permute.xlu0 %786  ;;  %v4155_v9 = vrot.slane %v3336_v17, %v3976_v54  ;;  %v3422_v48 = vpack.c.bf16 %v742_v1, %v3838_v14  ;;  %v4160_v56 = vrot.slane %v4057_v31, %v3972_v52  ;;  %v755_v18 = vsel %vm754_vm7, %v751_v13, %v753_v38 }
 0x19c   : > { %v797_v43 = vsel %vm794_vm8, %v787_v39, %v789_v8  ;;  %v3438_v11 = vpack.c.bf16 %v744_v60, %v3840_v15  ;;  %v757_v19 = vsel %vm754_vm7, %v4045_v30, %v749_v16  ;;  %v785_v46 = vmul.f32 %v4073_v47, %v758_v63 }
 0x19d   : > { %3435 = vmatpush1.bf16.msra.mxu1 %v3434_v36  ;;  %v783_v33 = vmul.f32 %v4079_v7, %v756_v35  ;;  %v822_v31 = vmul.f32 %v4137_v45, %v797_v43  ;;  %v784_v30 = vmul.f32 %v4132_v0, %v755_v18  ;;  %v782_v17 = vmul.f32 %v4160_v56, %v757_v19  ;;  %v870_v19 = vld [vmem:[%s4953_s3] sm:$0xff] }
 0x19e   : > { %3419 = vmatpush1.bf16.msra.mxu0 %v3418_v51  ;;  %3437 = vmatprep.subr.bf16.mxu1 %v3436_v10  ;;  %v4190_v51 = vrot.slane %v3337_v57, %v3974_v53  ;;  %v4193_v63 = vrot.slane %v3337_v57, %v3976_v54  ;;  %v4196_v35 = vrot.slane %v3337_v57, %v3972_v52 }
 0x19f   : > { %v793_v14 = vpop.permute.xlu1 %792  ;;  %3421 = vmatprep.subr.bf16.mxu0 %v3420_v26  ;;  %v791_v40 = vpop.permute.xlu0 %790 }
 0x1a0   : > { %v798_v13 = vsel %vm794_vm8, %v793_v14, %v787_v39  ;;  %v795_v38 = vsel %vm794_vm8, %v791_v40, %v793_v14  ;;  %v796_v15 = vsel %vm794_vm8, %v789_v8, %v791_v40  ;;  %v3426_v8 = vpack.c.bf16 %v822_v31, %v782_v17  ;;  %v872_v14 = vld [vmem:[%s4953_s3 + $0x10] sm:$0xff]  ;;  %v873_v40 = vld [vmem:[%s4953_s3 + $0x18] sm:$0xff] }
 0x1a1   : > { %v825_v16 = vmul.f32 %v4140_v50, %v798_v13  ;;  %v823_v22 = vmul.f32 %v4152_v27, %v796_v15  ;;  %v824_v49 = vmul.f32 %v4155_v9, %v795_v38  ;;  %3439 = vmatpush1.bf16.msra.mxu1 %v3438_v11  ;;  %v4187_v39 = vrot.slane %v3337_v57, %v3942_v32 }
 0x1a2   : > { %3423 = vmatpush1.bf16.msra.mxu0 %v3422_v48  ;;  %v3724_v31 = vmov 1   ;;  %v4994_v13 = vmov 0  }
 0x1a3   : > { %v3442_v55 = vpack.c.bf16 %v824_v49, %v784_v30  ;;  %v829_v2 = vpop.permute.xlu1 %828  ;;  %v827_v1 = vpop.permute.xlu0 %826  ;;  %v3424_v36 = vpack.c.bf16 %v823_v22, %v783_v33  ;;  %v3440_v60 = vpack.c.bf16 %v825_v16, %v785_v46  ;;  %v4993_v46 = vmov 0.0   ;;  %v871_v33 = vld [vmem:[%s4953_s3 + $0x8] sm:$0xff]  ;;  %3669 = vset.pattern.permute.xlu1 %v3724_v31  ;;  %3670 = vset.pattern.permute.xlu0 %v3724_v31 }
 0x1a4   : > { %v837_v10 = vsel %vm834_vm9, %v827_v1, %v829_v2  ;;  %1106 = vperm.xlu1 %3669, %v3913_v20   ;;  %1110 = vperm.xlu0 %3670, %v3918_v21  }
 0x1a5   : > { %3425 = vmatprep.subr.bf16.mxu0 %v3424_v36  ;;  %3441 = vmatprep.subr.bf16.mxu1 %v3440_v60  ;;  %v862_v11 = vmul.f32 %v4196_v35, %v837_v10 }
 0x1a6   : > { %3427 = vmatpush1.bf16.msra.mxu0 %v3426_v8  ;;  %3443 = vmatpush1.bf16.msra.mxu1 %v3442_v55 }
 0x1a7   : > { %v833_v43 = vpop.permute.xlu1 %832  ;;  %v831_v26 = vpop.permute.xlu0 %830 }
 0x1a8   : > { %v838_v32 = vsel %vm834_vm9, %v833_v43, %v827_v1  ;;  %v835_v53 = vsel %vm834_vm9, %v831_v26, %v833_v43  ;;  %v836_v54 = vsel %vm834_vm9, %v829_v2, %v831_v26  ;;  %1114 = vperm.xlu1 %3669, %v3927_v23   ;;  %3671 = vset.pattern.permute.xlu0 %v4994_v13 }
 0x1a9   : > { %v865_v48 = vmul.f32 %v4187_v39, %v838_v32  ;;  %v863_v52 = vmul.f32 %v4190_v51, %v836_v54  ;;  %v864_v18 = vmul.f32 %v4193_v63, %v835_v53 }
 0x1ab   : > { %923 = vmatprep.subr.mxu0 %v863_v52  ;;  %1012 = vmatprep.subr.mxu1 %v865_v48 }
 0x1ac   : > { %924 = vmatpush1.msra.mxu0 %v862_v11  ;;  %1013 = vmatpush1.msra.mxu1 %v864_v18 }
 0x1ad   : > { %3338 = vmatmul.mubr.msk.f32.vlgmr.msra.gmra.mrb[6].mxu0 %vm894_vm10, %v870_v19  ;;  %3342 = vmatmul.mubr.msk.f32.vlgmr.msra.gmra.mrb[6].mxu1 %vm894_vm10, %v870_v19 }
 0x1ae   : > { %977 = vmatprep.mubr.f32.mxu0 %v4993_v46  ;;  %1066 = vmatprep.mubr.f32.mxu1 %v4993_v46 }
 0x1af   : > { %1118 = vperm.xlu1 %3669, %v3932_v24  }
 0x1b1   : > { %3339 = vmatmul.mubr.msk.f32.gmra.mrb[8].mxu0 %vm894_vm10, %v871_v33  ;;  %3343 = vmatmul.mubr.msk.f32.gmra.mrb[8].mxu1 %vm894_vm10, %v871_v33 }
 0x1b2   : > { %983 = vmatprep.mubr.f32.mxu0 %v4993_v46  ;;  %1072 = vmatprep.mubr.f32.mxu1 %v4993_v46 }
 0x1b3   : > { %3673 = vset.pattern.permute.xlu1 %v4994_v13 }
 0x1b5   : > { %3340 = vmatmul.mubr.msk.f32.gmra.mrb[10].mxu0 %vm894_vm10, %v872_v14  ;;  %3344 = vmatmul.mubr.msk.f32.gmra.mrb[10].mxu1 %vm894_vm10, %v872_v14 }
 0x1b6   : > { %989 = vmatprep.mubr.f32.mxu0 %v4993_v46  ;;  %1078 = vmatprep.mubr.f32.mxu1 %v4993_v46 }
 0x1b8   : > { %v877_v38 = vpop.permute.xlu0 %876  ;;  %v882_v15 = vpop.permute.xlu1 %881 }
 0x1b9   : > { %3341 = vmatmul.mubr.msk.f32.gmra.mrb[12].mxu0 %vm894_vm10, %v873_v40  ;;  %3345 = vmatmul.mubr.msk.f32.gmra.mrb[12].mxu1 %vm894_vm10, %v873_v40 }
 0x1ba   : > { %1198 = vmatprep.mubr.f32.mxu0 %v4993_v46  ;;  %1287 = vmatprep.mubr.f32.mxu1 %v4993_v46 }
 0x1bc   : > { %v887_v54 = vpop.permute.xlu1 %886 }
 0x280   : > { %v973_v30 = vpop.f32.mrb[6].mxu0  ;;  %v1062_v16 = vpop.f32.mrb[6].mxu1 }
 0x281   : > { %v975_v22 = vpop.f32.mrb[7].mxu0  ;;  %v1063_v49 = vadd.f32 %v1062_v16, %v877_v38  ;;  %v1064_v17 = vpop.f32.mrb[7].mxu1  ;;  %v974_v2 = vadd.f32 %v973_v30, %v877_v38 }
 0x282   : > { %v1065_v55 = vadd.f32 %v1064_v17, %v877_v38  ;;  %v976_v20 = vadd.f32 %v975_v22, %v877_v38  ;;  %v892_v16 = vpop.permute.xlu0 %891 }
 0x283   : > { %v1087_v1 = vmax.f32 %v1063_v49, 0.0  ;;  %v1085_v26 = vmax.f32 %v974_v2, 0.0 }
 0x284   : > { %v979_v57 = vpop.f32.mrb[8].mxu0  ;;  %v1068_v21 = vpop.f32.mrb[8].mxu1  ;;  %v1088_v24 = vmax.f32 %v1065_v55, 0.0  ;;  %v1086_v48 = vmax.f32 %v976_v20, 0.0 }
 0x285   : > { %v980_v23 = vadd.f32 %v979_v57, %v882_v15  ;;  %v1069_v36 = vadd.f32 %v1068_v21, %v882_v15  ;;  %v981_v60 = vpop.f32.mrb[9].mxu0  ;;  %v1070_v8 = vpop.f32.mrb[9].mxu1 }
 0x286   : > { %v982_v10 = vadd.f32 %v981_v60, %v882_v15  ;;  %v1071_v43 = vadd.f32 %v1070_v8, %v882_v15 }
 0x287   : > { %v1089_v32 = vmax.f32 %v980_v23, 0.0  ;;  %v1091_v53 = vmax.f32 %v1069_v36, 0.0 }
 0x288   : > { %v1090_v52 = vmax.f32 %v982_v10, 0.0  ;;  %v1092_v18 = vmax.f32 %v1071_v43, 0.0  ;;  %v985_v11 = vpop.f32.mrb[10].mxu0  ;;  %v1074_v19 = vpop.f32.mrb[10].mxu1 }
 0x289   : > { %v3446_v33 = vpack.c.bf16 %v1089_v32, %v1085_v26  ;;  %v3454_v14 = vpack.c.bf16 %v1091_v53, %v1087_v1  ;;  %v987_v40 = vpop.f32.mrb[11].mxu0  ;;  %v1076_v13 = vpop.f32.mrb[11].mxu1  ;;  %v986_v22 = vadd.f32 %v985_v11, %v887_v54  ;;  %v1075_v49 = vadd.f32 %v1074_v19, %v887_v54  ;;  %v1101_v11 = vld [vmem:[%s4955_s5] sm:$0xff]  ;;  %v1102_v19 = vld [vmem:[%s4955_s5 + $0x8] sm:$0xff] }
 0x28a   : > { %v3444_v38 = vpack.c.bf16 %v1090_v52, %v1086_v48  ;;  %v3452_v30 = vpack.c.bf16 %v1092_v18, %v1088_v24  ;;  %v988_v17 = vadd.f32 %v987_v40, %v887_v54  ;;  %v1077_v15 = vadd.f32 %v1076_v13, %v887_v54  ;;  %v4277_v40 = vld [vmem:[%s4957_s7] sm:$0xff]  ;;  %v1107_v13 = vpop.permute.xlu1 %1106 }
 0x28b   : > { %v1093_v60 = vmax.f32 %v986_v22, 0.0  ;;  %v1095_v8 = vmax.f32 %v1075_v49, 0.0  ;;  %1526 = vperm.xlu0 %3671, %v4277_v40  }
 0x28c   : > { %v991_v55 = vpop.f32.mrb[12].mxu0  ;;  %v1080_v2 = vpop.f32.mrb[12].mxu1  ;;  %3445 = vmatprep.subr.bf16.mxu0 %v3444_v38  ;;  %3453 = vmatprep.subr.bf16.mxu1 %v3452_v30  ;;  %v1094_v43 = vmax.f32 %v988_v17, 0.0  ;;  %v1096_v26 = vmax.f32 %v1077_v15, 0.0 }
 0x28d   : > { %v992_v20 = vadd.f32 %v991_v55, %v892_v16  ;;  %v1081_v57 = vadd.f32 %v1080_v2, %v892_v16  ;;  %v993_v21 = vpop.f32.mrb[13].mxu0  ;;  %v1082_v23 = vpop.f32.mrb[13].mxu1  ;;  %3447 = vmatpush1.bf16.msra.mxu0 %v3446_v33  ;;  %3455 = vmatpush1.bf16.msra.mxu1 %v3454_v14  ;;  %v1103_v33 = vld [vmem:[%s4955_s5 + $0x10] sm:$0xff]  ;;  %v1104_v14 = vld [vmem:[%s4955_s5 + $0x18] sm:$0xff] }
 0x28e   : > { %v994_v1 = vadd.f32 %v993_v21, %v892_v16  ;;  %v1083_v36 = vadd.f32 %v1082_v23, %v892_v16  ;;  %v1111_v15 = vpop.permute.xlu0 %1110  ;;  %v1115_v2 = vpop.permute.xlu1 %1114 }
 0x28f   : > { %v1097_v24 = vmax.f32 %v992_v20, 0.0  ;;  %v1099_v10 = vmax.f32 %v1081_v57, 0.0  ;;  %3672 = vset.pattern.permute.xlu0 %v3724_v31 }
 0x290   : > { %v1098_v32 = vmax.f32 %v994_v1, 0.0  ;;  %v1100_v53 = vmax.f32 %v1083_v36, 0.0 }
 0x291   : > { %v3450_v54 = vpack.c.bf16 %v1097_v24, %v1093_v60  ;;  %v3458_v48 = vpack.c.bf16 %v1099_v10, %v1095_v8 }
 0x292   : > { %v3448_v52 = vpack.c.bf16 %v1098_v32, %v1094_v43  ;;  %v3456_v18 = vpack.c.bf16 %v1100_v53, %v1096_v26 }
 0x294   : > { %3449 = vmatprep.subr.bf16.mxu0 %v3448_v52  ;;  %3457 = vmatprep.subr.bf16.mxu1 %v3456_v18 }
 0x295   : > { %3451 = vmatpush1.bf16.msra.mxu0 %v3450_v54  ;;  %3459 = vmatpush1.bf16.msra.mxu1 %v3458_v48 }
 0x298   : > { %3346 = vmatmul.mubr.msk.f32.vlgmr.msra.gmra.mrb[14].mxu0 %vm1121_vm11, %v1101_v11  ;;  %3350 = vmatmul.mubr.msk.f32.vlgmr.msra.gmra.mrb[14].mxu1 %vm1121_vm11, %v1101_v11 }
 0x299   : > { %1204 = vmatprep.mubr.f32.mxu0 %v4993_v46  ;;  %1293 = vmatprep.mubr.f32.mxu1 %v4993_v46 }
 0x29c   : > { %3347 = vmatmul.mubr.msk.f32.gmra.mrb[16].mxu0 %vm1121_vm11, %v1102_v19  ;;  %3351 = vmatmul.mubr.msk.f32.gmra.mrb[16].mxu1 %vm1121_vm11, %v1102_v19 }
 0x29d   : > { %1210 = vmatprep.mubr.f32.mxu0 %v4993_v46  ;;  %1299 = vmatprep.mubr.f32.mxu1 %v4993_v46 }
 0x2a0   : > { %3348 = vmatmul.mubr.msk.f32.gmra.mrb[18].mxu0 %vm1121_vm11, %v1103_v33  ;;  %3352 = vmatmul.mubr.msk.f32.gmra.mrb[18].mxu1 %vm1121_vm11, %v1103_v33 }
 0x2a1   : > { %1216 = vmatprep.mubr.f32.mxu0 %v4993_v46  ;;  %1305 = vmatprep.mubr.f32.mxu1 %v4993_v46 }
 0x2a4   : > { %3349 = vmatmul.mubr.msk.f32.gmra.mrb[20].mxu0 %vm1121_vm11, %v1104_v14  ;;  %3353 = vmatmul.mubr.msk.f32.gmra.mrb[20].mxu1 %vm1121_vm11, %v1104_v14 }
 0x2a5   : > { %1402 = vmatprep.mubr.f32.mxu0 %v4993_v46  ;;  %1479 = vmatprep.mubr.f32.mxu1 %v4993_v46 }
 0x36b   : > { %v1200_v38 = vpop.f32.mrb[14].mxu0  ;;  %v1289_v30 = vpop.f32.mrb[14].mxu1 }
 0x36c   : > { %v1202_v16 = vpop.f32.mrb[15].mxu0  ;;  %v1290_v22 = vadd.f32 %v1289_v30, %v1107_v13  ;;  %v1291_v49 = vpop.f32.mrb[15].mxu1  ;;  %v1201_v55 = vadd.f32 %v1200_v38, %v1107_v13 }
 0x36d   : > { %v1292_v17 = vadd.f32 %v1291_v49, %v1107_v13  ;;  %v1203_v20 = vadd.f32 %v1202_v16, %v1107_v13  ;;  %v1119_v30 = vpop.permute.xlu1 %1118 }
 0x36e   : > { %v1314_v23 = vmax.f32 %v1290_v22, 0.0  ;;  %v1312_v43 = vmax.f32 %v1201_v55, 0.0 }
 0x36f   : > { %v1206_v57 = vpop.f32.mrb[16].mxu0  ;;  %v1295_v21 = vpop.f32.mrb[16].mxu1  ;;  %v1315_v24 = vmax.f32 %v1292_v17, 0.0  ;;  %v1313_v53 = vmax.f32 %v1203_v20, 0.0 }
 0x370   : > { %v1207_v1 = vadd.f32 %v1206_v57, %v1111_v15  ;;  %v1296_v36 = vadd.f32 %v1295_v21, %v1111_v15  ;;  %v1208_v60 = vpop.f32.mrb[17].mxu0  ;;  %v1297_v8 = vpop.f32.mrb[17].mxu1 }
 0x371   : > { %v1209_v31 = vadd.f32 %v1208_v60, %v1111_v15  ;;  %v1298_v10 = vadd.f32 %v1297_v8, %v1111_v15 }
 0x372   : > { %v1316_v26 = vmax.f32 %v1207_v1, 0.0  ;;  %v1318_v32 = vmax.f32 %v1296_v36, 0.0 }
 0x373   : > { %v1317_v54 = vmax.f32 %v1209_v31, 0.0  ;;  %v1319_v48 = vmax.f32 %v1298_v10, 0.0  ;;  %v1212_v52 = vpop.f32.mrb[18].mxu0  ;;  %v1301_v18 = vpop.f32.mrb[18].mxu1 }
 0x374   : > { %v4281_v11 = vpack.c.bf16 %v1316_v26, %v1312_v43  ;;  %v4283_v19 = vpack.c.bf16 %v1318_v32, %v1314_v23  ;;  %v1214_v33 = vpop.f32.mrb[19].mxu0  ;;  %v1303_v14 = vpop.f32.mrb[19].mxu1  ;;  %v1213_v16 = vadd.f32 %v1212_v52, %v1115_v2  ;;  %v1302_v22 = vadd.f32 %v1301_v18, %v1115_v2  ;;  %v1330_v52 = vld [vmem:[%s4956_s6] sm:$0xff]  ;;  %v1331_v18 = vld [vmem:[%s4956_s6 + $0x8] sm:$0xff] }
 0x375   : > { %v4285_v13 = vpack.c.bf16 %v1317_v54, %v1313_v53  ;;  %v4287_v38 = vpack.c.bf16 %v1319_v48, %v1315_v24  ;;  %v1215_v49 = vadd.f32 %v1214_v33, %v1115_v2  ;;  %v1304_v17 = vadd.f32 %v1303_v14, %v1115_v2  ;;  %v3358_v33 = vld [vmem:[%s4956_s6 + $0x10] sm:$0xff]  ;;  %v3359_v14 = vld [vmem:[%s4956_s6 + $0x18] sm:$0xff] }
 0x376   : > { %v1320_v60 = vmax.f32 %v1213_v16, 0.0  ;;  %v1322_v8 = vmax.f32 %v1302_v22, 0.0  ;;  %v3365_v16 = vld [vmem:[%s4956_s6 + $0x28] sm:$0xff]  ;;  %v3370_v22 = vld [vmem:[%s4956_s6 + $0x30] sm:$0xff] }
 0x377   : > { %v1218_v15 = vpop.f32.mrb[20].mxu0  ;;  %v1307_v55 = vpop.f32.mrb[20].mxu1  ;;  %3461 = vmatprep.subr.bf16.mxu0 %v4285_v13  ;;  %3469 = vmatprep.subr.bf16.mxu1 %v4287_v38  ;;  %v1321_v31 = vmax.f32 %v1215_v49, 0.0  ;;  %v1323_v10 = vmax.f32 %v1304_v17, 0.0  ;;  %v3371_v49 = vld [vmem:[%s4956_s6 + $0x38] sm:$0xff]  ;;  %v3376_v17 = vld [vmem:[%s4956_s6 + $0x40] sm:$0xff] }
 0x378   : > { %v1219_v20 = vadd.f32 %v1218_v15, %v1119_v30  ;;  %v1308_v57 = vadd.f32 %v1307_v55, %v1119_v30  ;;  %v1220_v21 = vpop.f32.mrb[21].mxu0  ;;  %v1309_v23 = vpop.f32.mrb[21].mxu1  ;;  %3463 = vmatpush1.bf16.msra.mxu0 %v4281_v11  ;;  %3471 = vmatpush1.bf16.msra.mxu1 %v4283_v19  ;;  %v3377_v15 = vld [vmem:[%s4956_s6 + $0x48] sm:$0xff]  ;;  %v3382_v55 = vld [vmem:[%s4956_s6 + $0x50] sm:$0xff] }
 0x379   : > { %v1221_v1 = vadd.f32 %v1220_v21, %v1119_v30  ;;  %v1310_v36 = vadd.f32 %v1309_v23, %v1119_v30  ;;  %v3364_v30 = vld [vmem:[%s4956_s6 + $0x20] sm:$0xff]  ;;  %v3389_v21 = vld [vmem:[%s4956_s6 + $0x68] sm:$0xff]  ;;  %v3394_v23 = vld [vmem:[%s4956_s6 + $0x70] sm:$0xff] }
 0x37a   : > { %v1324_v24 = vmax.f32 %v1219_v20, 0.0  ;;  %v1326_v2 = vmax.f32 %v1308_v57, 0.0  ;;  %v3383_v20 = vld [vmem:[%s4956_s6 + $0x58] sm:$0xff]  ;;  %v3388_v57 = vld [vmem:[%s4956_s6 + $0x60] sm:$0xff] }
 0x37b   : > { %v1325_v43 = vmax.f32 %v1221_v1, 0.0  ;;  %v1327_v26 = vmax.f32 %v1310_v36, 0.0  ;;  %v3395_v1 = vld [vmem:[%s4956_s6 + $0x78] sm:$0xff] }
 0x37c   : > { %v4293_v32 = vpack.c.bf16 %v1324_v24, %v1320_v60  ;;  %v4295_v53 = vpack.c.bf16 %v1326_v2, %v1322_v8 }
 0x37d   : > { %v4297_v54 = vpack.c.bf16 %v1325_v43, %v1321_v31  ;;  %v4299_v48 = vpack.c.bf16 %v1327_v26, %v1323_v10 }
 0x37f   : > { %3465 = vmatprep.subr.bf16.mxu0 %v4297_v54  ;;  %3473 = vmatprep.subr.bf16.mxu1 %v4299_v48 }
 0x380   : > { %3467 = vmatpush1.bf16.msra.mxu0 %v4293_v32  ;;  %3475 = vmatpush1.bf16.msra.mxu1 %v4295_v53 }
 0x381   : > { %3477 = vmatprep.subr.bf16.mxu0 %v4285_v13  ;;  %3485 = vmatprep.subr.bf16.mxu1 %v4287_v38 }
 0x383   : > { %3354 = vmatmul.mubr.msk.f32.vlgmr.msra.gmra.mrb[22].mxu0 %vm1121_vm11, %v1330_v52  ;;  %3356 = vmatmul.mubr.msk.f32.vlgmr.msra.gmra.mrb[22].mxu1 %vm1121_vm11, %v1330_v52 }
 0x384   : > { %3479 = vmatpush1.bf16.msra.mxu0 %v4281_v11  ;;  %3487 = vmatpush1.bf16.msra.mxu1 %v4283_v19 }
 0x385   : > { %3481 = vmatprep.subr.bf16.mxu0 %v4297_v54  ;;  %3489 = vmatprep.subr.bf16.mxu1 %v4299_v48 }
 0x386   : > { %1408 = vmatprep.mubr.f32.mxu0 %v4993_v46  ;;  %1485 = vmatprep.mubr.f32.mxu1 %v4993_v46 }
 0x387   : > { %3355 = vmatmul.mubr.msk.f32.gmra.mrb[24].mxu0 %vm1121_vm11, %v1331_v18  ;;  %3357 = vmatmul.mubr.msk.f32.gmra.mrb[24].mxu1 %vm1121_vm11, %v1331_v18 }
 0x388   : > { %3483 = vmatpush1.bf16.msra.mxu0 %v4293_v32  ;;  %3491 = vmatpush1.bf16.msra.mxu1 %v4295_v53 }
 0x389   : > { %3493 = vmatprep.subr.bf16.mxu0 %v4285_v13  ;;  %3501 = vmatprep.subr.bf16.mxu1 %v4287_v38 }
 0x38a   : > { %1615 = vmatprep.mubr.f32.mxu0 %v4993_v46  ;;  %1692 = vmatprep.mubr.f32.mxu1 %v4993_v46 }
 0x38b   : > { %3360 = vmatmul.mubr.msk.f32.vlgmr.msra.gmra.mrb[26].mxu0 %vm1121_vm11, %v3358_v33  ;;  %3362 = vmatmul.mubr.msk.f32.vlgmr.msra.gmra.mrb[26].mxu1 %vm1121_vm11, %v3358_v33 }
 0x38c   : > { %3495 = vmatpush1.bf16.msra.mxu0 %v4281_v11  ;;  %3503 = vmatpush1.bf16.msra.mxu1 %v4283_v19 }
 0x38d   : > { %3497 = vmatprep.subr.bf16.mxu0 %v4297_v54  ;;  %3505 = vmatprep.subr.bf16.mxu1 %v4299_v48 }
 0x38e   : > { %1621 = vmatprep.mubr.f32.mxu0 %v4993_v46  ;;  %1698 = vmatprep.mubr.f32.mxu1 %v4993_v46 }
 0x38f   : > { %3361 = vmatmul.mubr.msk.f32.gmra.mrb[28].mxu0 %vm1121_vm11, %v3359_v14  ;;  %3363 = vmatmul.mubr.msk.f32.gmra.mrb[28].mxu1 %vm1121_vm11, %v3359_v14 }
 0x390   : > { %3499 = vmatpush1.bf16.msra.mxu0 %v4293_v32  ;;  %3507 = vmatpush1.bf16.msra.mxu1 %v4295_v53 }
 0x391   : > { %3509 = vmatprep.subr.bf16.mxu0 %v4285_v13  ;;  %3517 = vmatprep.subr.bf16.mxu1 %v4287_v38 }
 0x392   : > { %1818 = vmatprep.mubr.f32.mxu0 %v4993_v46  ;;  %1895 = vmatprep.mubr.f32.mxu1 %v4993_v46 }
 0x393   : > { %3366 = vmatmul.mubr.msk.f32.vlgmr.msra.gmra.mrb[30].mxu0 %vm1121_vm11, %v3364_v30  ;;  %3368 = vmatmul.mubr.msk.f32.vlgmr.msra.gmra.mrb[30].mxu1 %vm1121_vm11, %v3364_v30 }
 0x394   : > { %3511 = vmatpush1.bf16.msra.mxu0 %v4281_v11  ;;  %3519 = vmatpush1.bf16.msra.mxu1 %v4283_v19 }
 0x395   : > { %3513 = vmatprep.subr.bf16.mxu0 %v4297_v54  ;;  %3521 = vmatprep.subr.bf16.mxu1 %v4299_v48 }
 0x396   : > { %1824 = vmatprep.mubr.f32.mxu0 %v4993_v46  ;;  %1901 = vmatprep.mubr.f32.mxu1 %v4993_v46 }
 0x397   : > { %3367 = vmatmul.mubr.msk.f32.gmra.mrb[32].mxu0 %vm1121_vm11, %v3365_v16  ;;  %3369 = vmatmul.mubr.msk.f32.gmra.mrb[32].mxu1 %vm1121_vm11, %v3365_v16 }
 0x398   : > { %3515 = vmatpush1.bf16.msra.mxu0 %v4293_v32  ;;  %3523 = vmatpush1.bf16.msra.mxu1 %v4295_v53 }
 0x399   : > { %3525 = vmatprep.subr.bf16.mxu0 %v4285_v13  ;;  %3533 = vmatprep.subr.bf16.mxu1 %v4287_v38 }
 0x39a   : > { %2021 = vmatprep.mubr.f32.mxu0 %v4993_v46  ;;  %2098 = vmatprep.mubr.f32.mxu1 %v4993_v46 }
 0x39b   : > { %3372 = vmatmul.mubr.msk.f32.vlgmr.msra.gmra.mrb[34].mxu0 %vm1121_vm11, %v3370_v22  ;;  %3374 = vmatmul.mubr.msk.f32.vlgmr.msra.gmra.mrb[34].mxu1 %vm1121_vm11, %v3370_v22 }
 0x39c   : > { %3527 = vmatpush1.bf16.msra.mxu0 %v4281_v11  ;;  %3535 = vmatpush1.bf16.msra.mxu1 %v4283_v19 }
 0x39d   : > { %3529 = vmatprep.subr.bf16.mxu0 %v4297_v54  ;;  %3537 = vmatprep.subr.bf16.mxu1 %v4299_v48 }
 0x39e   : > { %2027 = vmatprep.mubr.f32.mxu0 %v4993_v46  ;;  %2104 = vmatprep.mubr.f32.mxu1 %v4993_v46 }
 0x39f   : > { %3373 = vmatmul.mubr.msk.f32.gmra.mrb[36].mxu0 %vm1121_vm11, %v3371_v49  ;;  %3375 = vmatmul.mubr.msk.f32.gmra.mrb[36].mxu1 %vm1121_vm11, %v3371_v49 }
 0x3a0   : > { %3531 = vmatpush1.bf16.msra.mxu0 %v4293_v32  ;;  %3539 = vmatpush1.bf16.msra.mxu1 %v4295_v53 }
 0x3a1   : > { %3541 = vmatprep.subr.bf16.mxu0 %v4285_v13  ;;  %3549 = vmatprep.subr.bf16.mxu1 %v4287_v38 }
 0x3a2   : > { %2224 = vmatprep.mubr.f32.mxu0 %v4993_v46  ;;  %2301 = vmatprep.mubr.f32.mxu1 %v4993_v46 }
 0x3a3   : > { %3378 = vmatmul.mubr.msk.f32.vlgmr.msra.gmra.mrb[38].mxu0 %vm1121_vm11, %v3376_v17  ;;  %3380 = vmatmul.mubr.msk.f32.vlgmr.msra.gmra.mrb[38].mxu1 %vm1121_vm11, %v3376_v17 }
 0x3a4   : > { %3543 = vmatpush1.bf16.msra.mxu0 %v4281_v11  ;;  %3551 = vmatpush1.bf16.msra.mxu1 %v4283_v19 }
 0x3a5   : > { %3545 = vmatprep.subr.bf16.mxu0 %v4297_v54  ;;  %3553 = vmatprep.subr.bf16.mxu1 %v4299_v48 }
 0x3a6   : > { %2230 = vmatprep.mubr.f32.mxu0 %v4993_v46  ;;  %2307 = vmatprep.mubr.f32.mxu1 %v4993_v46 }
 0x3a7   : > { %3379 = vmatmul.mubr.msk.f32.gmra.mrb[0].mxu0 %vm1121_vm11, %v3377_v15  ;;  %3381 = vmatmul.mubr.msk.f32.gmra.mrb[0].mxu1 %vm1121_vm11, %v3377_v15 }
 0x3a8   : > { %3547 = vmatpush1.bf16.msra.mxu0 %v4293_v32  ;;  %3555 = vmatpush1.bf16.msra.mxu1 %v4295_v53 }
 0x3a9   : > { %3557 = vmatprep.subr.bf16.mxu0 %v4285_v13  ;;  %3565 = vmatprep.subr.bf16.mxu1 %v4287_v38 }
 0x3aa   : > { %2395 = vmatprep.mubr.f32.mxu0 %v4993_v46  ;;  %2472 = vmatprep.mubr.f32.mxu1 %v4993_v46 }
 0x3ab   : > { %3384 = vmatmul.mubr.msk.f32.vlgmr.msra.gmra.mrb[40].mxu0 %vm1121_vm11, %v3382_v55  ;;  %3386 = vmatmul.mubr.msk.f32.vlgmr.msra.gmra.mrb[40].mxu1 %vm1121_vm11, %v3382_v55 }
 0x3ac   : > { %3559 = vmatpush1.bf16.msra.mxu0 %v4281_v11  ;;  %3567 = vmatpush1.bf16.msra.mxu1 %v4283_v19 }
 0x3ad   : > { %3561 = vmatprep.subr.bf16.mxu0 %v4297_v54  ;;  %3569 = vmatprep.subr.bf16.mxu1 %v4299_v48 }
 0x3ae   : > { %2401 = vmatprep.mubr.f32.mxu0 %v4993_v46  ;;  %2478 = vmatprep.mubr.f32.mxu1 %v4993_v46 }
 0x3af   : > { %3385 = vmatmul.mubr.msk.f32.gmra.mrb[42].mxu0 %vm1121_vm11, %v3383_v20  ;;  %3387 = vmatmul.mubr.msk.f32.gmra.mrb[42].mxu1 %vm1121_vm11, %v3383_v20 }
 0x3b0   : > { %3563 = vmatpush1.bf16.msra.mxu0 %v4293_v32  ;;  %3571 = vmatpush1.bf16.msra.mxu1 %v4295_v53 }
 0x3b1   : > { %3573 = vmatprep.subr.bf16.mxu0 %v4285_v13  ;;  %3581 = vmatprep.subr.bf16.mxu1 %v4287_v38 }
 0x3b2   : > { %2598 = vmatprep.mubr.f32.mxu0 %v4993_v46  ;;  %2675 = vmatprep.mubr.f32.mxu1 %v4993_v46 }
 0x3b3   : > { %3390 = vmatmul.mubr.msk.f32.vlgmr.msra.gmra.mrb[44].mxu0 %vm1121_vm11, %v3388_v57  ;;  %3392 = vmatmul.mubr.msk.f32.vlgmr.msra.gmra.mrb[44].mxu1 %vm1121_vm11, %v3388_v57 }
 0x3b4   : > { %3575 = vmatpush1.bf16.msra.mxu0 %v4281_v11  ;;  %3583 = vmatpush1.bf16.msra.mxu1 %v4283_v19 }
 0x3b5   : > { %3577 = vmatprep.subr.bf16.mxu0 %v4297_v54  ;;  %3585 = vmatprep.subr.bf16.mxu1 %v4299_v48 }
 0x3b6   : > { %2604 = vmatprep.mubr.f32.mxu0 %v4993_v46  ;;  %2681 = vmatprep.mubr.f32.mxu1 %v4993_v46 }
 0x3b7   : > { %3391 = vmatmul.mubr.msk.f32.gmra.mrb[46].mxu0 %vm1121_vm11, %v3389_v21  ;;  %3393 = vmatmul.mubr.msk.f32.gmra.mrb[46].mxu1 %vm1121_vm11, %v3389_v21 }
 0x3b8   : > { %3579 = vmatpush1.bf16.msra.mxu0 %v4293_v32  ;;  %3587 = vmatpush1.bf16.msra.mxu1 %v4295_v53 }
 0x3b9   : > { %3589 = vmatprep.subr.bf16.mxu0 %v4285_v13  ;;  %3597 = vmatprep.subr.bf16.mxu1 %v4287_v38 }
 0x3ba   : > { %2801 = vmatprep.mubr.f32.mxu0 %v4993_v46  ;;  %2878 = vmatprep.mubr.f32.mxu1 %v4993_v46 }
 0x3bb   : > { %3396 = vmatmul.mubr.msk.f32.vlgmr.msra.gmra.mrb[48].mxu0 %vm1121_vm11, %v3394_v23  ;;  %3398 = vmatmul.mubr.msk.f32.vlgmr.msra.gmra.mrb[48].mxu1 %vm1121_vm11, %v3394_v23 }
 0x3bc   : > { %3591 = vmatpush1.bf16.msra.mxu0 %v4281_v11  ;;  %3599 = vmatpush1.bf16.msra.mxu1 %v4283_v19  ;;  %v3400_v11 = vld [vmem:[%s4956_s6 + $0x80] sm:$0xff]  ;;  %v3401_v19 = vld [vmem:[%s4956_s6 + $0x88] sm:$0xff] }
 0x3bd   : > { %3593 = vmatprep.subr.bf16.mxu0 %v4297_v54  ;;  %3601 = vmatprep.subr.bf16.mxu1 %v4299_v48 }
 0x3be   : > { %2807 = vmatprep.mubr.f32.mxu0 %v4993_v46  ;;  %2884 = vmatprep.mubr.f32.mxu1 %v4993_v46 }
 0x3bf   : > { %3397 = vmatmul.mubr.msk.f32.gmra.mrb[50].mxu0 %vm1121_vm11, %v3395_v1  ;;  %3399 = vmatmul.mubr.msk.f32.gmra.mrb[50].mxu1 %vm1121_vm11, %v3395_v1 }
 0x3c0   : > { %3595 = vmatpush1.bf16.msra.mxu0 %v4293_v32  ;;  %3603 = vmatpush1.bf16.msra.mxu1 %v4295_v53 }
 0x3c1   : > { %3004 = vmatprep.mubr.f32.mxu0 %v4993_v46  ;;  %3081 = vmatprep.mubr.f32.mxu1 %v4993_v46 }
 0x3c3   : > { %3402 = vmatmul.mubr.msk.f32.vlgmr.msra.gmra.mrb[52].mxu0 %vm1121_vm11, %v3400_v11  ;;  %3404 = vmatmul.mubr.msk.f32.vlgmr.msra.gmra.mrb[52].mxu1 %vm1121_vm11, %v3400_v11 }
 0x3c4   : > { %3010 = vmatprep.mubr.f32.mxu0 %v4993_v46  ;;  %3087 = vmatprep.mubr.f32.mxu1 %v4993_v46 }
 0x3c7   : > { %3403 = vmatmul.mubr.msk.f32.gmra.mrb[54].mxu0 %vm1121_vm11, %v3401_v19  ;;  %3405 = vmatmul.mubr.msk.f32.gmra.mrb[54].mxu1 %vm1121_vm11, %v3401_v19 }
 0x456   : > { %v1404_v13 = vpop.f32.mrb[22].mxu0  ;;  %v1481_v38 = vpop.f32.mrb[22].mxu1 }
 0x457   : > { %1492 = vrot.lane.b32.xlu1 %v1404_v13, %s3715_s30  ;;  %v1406_v36 = vpop.f32.mrb[23].mxu0  ;;  %1500 = vrot.lane.b32.xlu0 %v1481_v38, %s3715_s30  ;;  %v1483_v60 = vpop.f32.mrb[23].mxu1 }
 0x45a   : > { %v4495_v8 = vpop.f32.mrb[24].mxu0  ;;  %v4497_v24 = vpop.f32.mrb[24].mxu1 }
 0x45b   : > { %1496 = vrot.lane.b32.xlu1 %v1406_v36, %s3715_s30  ;;  %v4500_v46 = vpop.f32.mrb[25].mxu0  ;;  %v4502_v2 = vpop.f32.mrb[25].mxu1 }
 0x45e   : > { %v1617_v31 = vpop.f32.mrb[26].mxu0  ;;  %v1694_v10 = vpop.f32.mrb[26].mxu1 }
 0x45f   : > { %1504 = vrot.lane.b32.xlu1 %v1483_v60, %s3715_s30  ;;  %1705 = vrot.lane.b32.xlu0 %v1617_v31, %s3716_s15  ;;  %v1619_v43 = vpop.f32.mrb[27].mxu0  ;;  %v1696_v26 = vpop.f32.mrb[27].mxu1 }
 0x462   : > { %v4506_v32 = vpop.f32.mrb[28].mxu0  ;;  %v4508_v53 = vpop.f32.mrb[28].mxu1 }
 0x463   : > { %1713 = vrot.lane.b32.xlu0 %v1694_v10, %s3716_s15  ;;  %1709 = vrot.lane.b32.xlu1 %v1619_v43, %s3716_s15  ;;  %v4512_v54 = vpop.f32.mrb[29].mxu0  ;;  %v4514_v48 = vpop.f32.mrb[29].mxu1 }
 0x466   : > { %v1820_v52 = vpop.f32.mrb[30].mxu0  ;;  %v1897_v18 = vpop.f32.mrb[30].mxu1 }
 0x467   : > { %1717 = vrot.lane.b32.xlu1 %v1696_v26, %s3716_s15  ;;  %1908 = vrot.lane.b32.xlu0 %v1820_v52, %s3717_s18  ;;  %v1822_v33 = vpop.f32.mrb[31].mxu0  ;;  %v1899_v14 = vpop.f32.mrb[31].mxu1 }
 0x46a   : > { %v4518_v30 = vpop.f32.mrb[32].mxu0  ;;  %v4520_v16 = vpop.f32.mrb[32].mxu1 }
 0x46b   : > { %1916 = vrot.lane.b32.xlu0 %v1897_v18, %s3717_s18  ;;  %1912 = vrot.lane.b32.xlu1 %v1822_v33, %s3717_s18  ;;  %v4524_v22 = vpop.f32.mrb[33].mxu0  ;;  %v4526_v49 = vpop.f32.mrb[33].mxu1 }
 0x46c   : > { %4995 = vst [vmem:[#allocation15_spill] sm:$0xff] %v4526_v49 }
 0x46e   : > { %v2023_v17 = vpop.f32.mrb[34].mxu0  ;;  %v2100_v15 = vpop.f32.mrb[34].mxu1 }
 0x46f   : > { %1920 = vrot.lane.b32.xlu1 %v1899_v14, %s3717_s18  ;;  %2111 = vrot.lane.b32.xlu0 %v2023_v17, %s3718_s19  ;;  %v2025_v55 = vpop.f32.mrb[35].mxu0  ;;  %v2102_v20 = vpop.f32.mrb[35].mxu1 }
 0x472   : > { %v4530_v57 = vpop.f32.mrb[36].mxu0  ;;  %v4532_v21 = vpop.f32.mrb[36].mxu1 }
 0x473   : > { %4996 = vst [vmem:[#allocation16_spill] sm:$0xff] %v4530_v57  ;;  %4997 = vst [vmem:[#allocation17_spill] sm:$0xff] %v4532_v21  ;;  %2119 = vrot.lane.b32.xlu0 %v2100_v15, %s3718_s19  ;;  %2115 = vrot.lane.b32.xlu1 %v2025_v55, %s3718_s19  ;;  %v4536_v23 = vpop.f32.mrb[37].mxu1  ;;  %v4538_v1 = vpop.f32.mrb[37].mxu0 }
 0x474   : > { %4998 = vst [vmem:[#allocation18_spill] sm:$0xff] %v4536_v23  ;;  %4999 = vst [vmem:[#allocation19_spill] sm:$0xff] %v4538_v1 }
 0x476   : > { %v4540_v11 = vpop.f32.mrb[38].mxu0  ;;  %v4542_v19 = vpop.f32.mrb[38].mxu1 }
 0x477   : > { %2123 = vrot.lane.b32.xlu1 %v2102_v20, %s3718_s19  ;;  %v4545_v13 = vpop.f32.mrb[39].mxu0  ;;  %v4547_v38 = vpop.f32.mrb[39].mxu1 }
 0x47a   : > { %v4549_v36 = vpop.f32.mrb[0].mxu0  ;;  %v4551_v60 = vpop.f32.mrb[0].mxu1 }
 0x47b   : > { %5000 = vst [vmem:[#allocation20_spill] sm:$0xff] %v4549_v36  ;;  %5001 = vst [vmem:[#allocation21_spill] sm:$0xff] %v4551_v60  ;;  %v4553_v31 = vpop.f32.mrb[1].mxu0  ;;  %v4555_v10 = vpop.f32.mrb[1].mxu1 }
 0x47c   : > { %5002 = vst [vmem:[#allocation22_spill] sm:$0xff] %v4553_v31  ;;  %5003 = vst [vmem:[#allocation23_spill] sm:$0xff] %v4555_v10 }
 0x47e   : > { %v2397_v43 = vpop.f32.mrb[40].mxu0  ;;  %v2474_v26 = vpop.f32.mrb[40].mxu1 }
 0x47f   : > { %2485 = vrot.lane.b32.xlu0 %v2397_v43, %s3719_s20  ;;  %v2399_v52 = vpop.f32.mrb[41].mxu0  ;;  %v2476_v18 = vpop.f32.mrb[41].mxu1 }
 0x480   : > { %2489 = vrot.lane.b32.xlu1 %v2399_v52, %s3719_s20 }
 0x482   : > { %v4559_v33 = vpop.f32.mrb[42].mxu0  ;;  %v4561_v14 = vpop.f32.mrb[42].mxu1 }
 0x483   : > { %5004 = vst [vmem:[#allocation24_spill] sm:$0xff] %v4559_v33  ;;  %5005 = vst [vmem:[#allocation25_spill] sm:$0xff] %v4561_v14  ;;  %2493 = vrot.lane.b32.xlu0 %v2474_v26, %s3719_s20  ;;  %v4564_v17 = vpop.f32.mrb[43].mxu0  ;;  %v4566_v15 = vpop.f32.mrb[43].mxu1 }
 0x484   : > { %5006 = vst [vmem:[#allocation26_spill] sm:$0xff] %v4564_v17  ;;  %5007 = vst [vmem:[#allocation27_spill] sm:$0xff] %v4566_v15  ;;  %2497 = vrot.lane.b32.xlu1 %v2476_v18, %s3719_s20 }
 0x486   : > { %v2600_v55 = vpop.f32.mrb[44].mxu0  ;;  %v2677_v20 = vpop.f32.mrb[44].mxu1 }
 0x487   : > { %2688 = vrot.lane.b32.xlu0 %v2600_v55, %s3720_s21  ;;  %v2602_v43 = vpop.f32.mrb[45].mxu0  ;;  %v2679_v10 = vpop.f32.mrb[45].mxu1 }
 0x488   : > { %2692 = vrot.lane.b32.xlu1 %v2602_v43, %s3720_s21 }
 0x48a   : > { %v4571_v52 = vpop.f32.mrb[46].mxu0  ;;  %v4573_v60 = vpop.f32.mrb[46].mxu1 }
 0x48b   : > { %5008 = vst [vmem:[#allocation28_spill] sm:$0xff] %v4571_v52  ;;  %5009 = vst [vmem:[#allocation29_spill] sm:$0xff] %v4573_v60  ;;  %2696 = vrot.lane.b32.xlu0 %v2677_v20, %s3720_s21  ;;  %v4576_v26 = vpop.f32.mrb[47].mxu0  ;;  %v4578_v31 = vpop.f32.mrb[47].mxu1 }
 0x48c   : > { %5010 = vst [vmem:[#allocation30_spill] sm:$0xff] %v4576_v26  ;;  %5011 = vst [vmem:[#allocation31_spill] sm:$0xff] %v4578_v31  ;;  %2700 = vrot.lane.b32.xlu1 %v2679_v10, %s3720_s21 }
 0x48e   : > { %v2803_v18 = vpop.f32.mrb[48].mxu0  ;;  %v2880_v36 = vpop.f32.mrb[48].mxu1 }
 0x48f   : > { %2891 = vrot.lane.b32.xlu0 %v2803_v18, %s3721_s22  ;;  %v2805_v55 = vpop.f32.mrb[49].mxu0  ;;  %v2882_v15 = vpop.f32.mrb[49].mxu1 }
 0x490   : > { %2895 = vrot.lane.b32.xlu1 %v2805_v55, %s3721_s22 }
 0x492   : > { %v4583_v43 = vpop.f32.mrb[50].mxu0  ;;  %v4585_v17 = vpop.f32.mrb[50].mxu1 }
 0x493   : > { %5012 = vst [vmem:[#allocation32_spill] sm:$0xff] %v4583_v43  ;;  %5013 = vst [vmem:[#allocation33_spill] sm:$0xff] %v4585_v17  ;;  %2899 = vrot.lane.b32.xlu0 %v2880_v36, %s3721_s22  ;;  %v4588_v20 = vpop.f32.mrb[51].mxu0  ;;  %v4590_v26 = vpop.f32.mrb[51].mxu1  ;;  %v1329_v36 = vld [vmem:[%s4957_s7 + $0x8] sm:$0xff] }
 0x494   : > { %5014 = vst [vmem:[#allocation34_spill] sm:$0xff] %v4588_v20  ;;  %5015 = vst [vmem:[#allocation35_spill] sm:$0xff] %v4590_v26  ;;  %2903 = vrot.lane.b32.xlu1 %v2882_v15, %s3721_s22 }
 0x496   : > { %v3006_v10 = vpop.f32.mrb[52].mxu0  ;;  %v3083_v31 = vpop.f32.mrb[52].mxu1 }
 0x497   : > { %3094 = vrot.lane.b32.xlu0 %v3006_v10, %s3722_s23  ;;  %v3008_v18 = vpop.f32.mrb[53].mxu0  ;;  %v3085_v60 = vpop.f32.mrb[53].mxu1 }
 0x498   : > { %3098 = vrot.lane.b32.xlu1 %v3008_v18, %s3722_s23 }
 0x49a   : > { %v4625_v55 = vpop.f32.mrb[54].mxu0 }
 0x49b   : > { %3102 = vrot.lane.b32.xlu0 %v3083_v31, %s3722_s23  ;;  %5016 = vst [vmem:[#allocation36_spill] sm:$0xff] %v4625_v55  ;;  %v4629_v10 = vpop.f32.mrb[55].mxu0 }
 0x49c   : > { %3106 = vrot.lane.b32.xlu1 %v3085_v60, %s3722_s23  ;;  %5018 = vst [vmem:[#allocation38_spill] sm:$0xff] %v4629_v10 }
 0x49f   : > { %3139 = vperm.xlu0 %3672, %v4277_v40   ;;  %v4623_v40 = vpop.permute.xlu0 %1526 }
 0x4a0   : > { %1531 = vperm.xlu1 %3673, %v1329_v36  }
 0x4a3   : > { %1494 = vrot.lane.b32.xlu0 %v4495_v8, %s3715_s30 }
 0x4a4   : > { %1498 = vrot.lane.b32.xlu1 %v4500_v46, %s3715_s30 }
 0x4a7   : > { %1506 = vrot.lane.b32.xlu0 %v4502_v2, %s3715_s30 }
 0x4a8   : > { %1502 = vrot.lane.b32.xlu1 %v4497_v24, %s3715_s30  ;;  %s338_s30 = scalar_select %p337_p8, %s3788_s12, 1 }
 0x4ab   : > { %1711 = vrot.lane.b32.xlu0 %v4512_v54, %s3716_s15 }
 0x4ac   : > { %1707 = vrot.lane.b32.xlu1 %v4506_v32, %s3716_s15 }
 0x4af   : > { %1719 = vrot.lane.b32.xlu0 %v4514_v48, %s3716_s15 }
 0x4b0   : > { %1715 = vrot.lane.b32.xlu1 %v4508_v53, %s3716_s15  ;;  %s3320_s15 = sshll.u32 %s338_s30, 1 }
 0x4b3   : > { %1914 = vrot.lane.b32.xlu0 %v4524_v22, %s3717_s18 }
 0x4b4   : > { %1910 = vrot.lane.b32.xlu1 %v4518_v30, %s3717_s18  ;;  %v4627_v30 = vpop.f32.mrb[54].mxu1 }
 0x4b5   : > { %5017 = vst [vmem:[#allocation37_spill] sm:$0xff] %v4627_v30 }
 0x4b8   : > { %1918 = vrot.lane.b32.xlu1 %v4520_v16, %s3717_s18  ;;  %v4631_v16 = vpop.f32.mrb[55].mxu1 }
 0x4b9   : > { %5019 = vst [vmem:[#allocation39_spill] sm:$0xff] %v4631_v16 }
 0x4c9   : > { %v1493_v8 = vpop.permute.xlu1 %1492  ;;  %v1501_v24 = vpop.permute.xlu0 %1500 }
 0x4cd   : > { %v1497_v46 = vpop.permute.xlu1 %1496 }
 0x4ce   : > { %v1512_v43 = vsel %vm555_vm2, %v1493_v8, %v1497_v46  ;;  %v1510_v23 = vsel %vm555_vm2, %v1497_v46, %v1501_v24 }
 0x4cf   : > { %v1517_v55 = vmul.f32 %v1512_v43, %v4061_v34  ;;  %v1518_v16 = vmul.f32 %v1510_v23, %v4069_v44 }
 0x4d1   : > { %v1505_v2 = vpop.permute.xlu1 %1504  ;;  %v1706_v32 = vpop.permute.xlu0 %1705 }
 0x4d2   : > { %v1514_v10 = vsel %vm555_vm2, %v1505_v2, %v1493_v8  ;;  %v1508_v49 = vsel %vm555_vm2, %v1501_v24, %v1505_v2  ;;  %v1535_v8 = vadd.f32 %v4623_v40, %v1517_v55 }
 0x4d3   : > { %v1516_v46 = vmul.f32 %v1514_v10, %v3985_v58  ;;  %v5020_v58 = vld [vmem:[#allocation4_spill] sm:$0xff] }
 0x4d5   : > { %v1710_v54 = vpop.permute.xlu1 %1709  ;;  %v1714_v48 = vpop.permute.xlu0 %1713 }
 0x4d6   : > { %v1725_v14 = vsel %vm594_vm3, %v1706_v32, %v1710_v54  ;;  %v1723_v23 = vsel %vm594_vm3, %v1710_v54, %v1714_v48 }
 0x4d7   : > { %v1730_v34 = vmul.f32 %v1725_v14, %v3994_v61  ;;  %v1519_v14 = vmul.f32 %v1508_v49, %v3955_v37  ;;  %v5021_v37 = vld [vmem:[#allocation10_spill] sm:$0xff] }
 0x4d9   : > { %v1718_v60 = vpop.permute.xlu1 %1717  ;;  %v1909_v53 = vpop.permute.xlu0 %1908 }
 0x4da   : > { %v1727_v33 = vsel %vm594_vm3, %v1718_v60, %v1706_v32  ;;  %v1536_v32 = vadd.f32 %v4623_v40, %v1518_v16  ;;  %v1721_v24 = vsel %vm594_vm3, %v1714_v48, %v1718_v60  ;;  %v1534_v16 = vadd.f32 %v4623_v40, %v1516_v46 }
 0x4db   : > { %v1729_v2 = vmul.f32 %v1727_v33, %v3988_v59  ;;  %v1731_v48 = vmul.f32 %v1723_v23, %v3997_v62  ;;  %v1738_v59 = vadd.f32 %v1730_v34, %v1535_v8  ;;  %v1732_v49 = vmul.f32 %v1721_v24, %v5020_v58 }
 0x4dd   : > { %v1913_v31 = vpop.permute.xlu1 %1912  ;;  %v1917_v15 = vpop.permute.xlu0 %1916  ;;  %v1737_v57 = vadd.f32 %v1729_v2, %v1534_v16  ;;  %v1739_v8 = vadd.f32 %v1731_v48, %v1536_v32  ;;  %v5023_v2 = vld [vmem:[#allocation12_spill] sm:$0xff] }
 0x4de   : > { %v1928_v43 = vsel %vm634_vm4, %v1909_v53, %v1913_v31  ;;  %v1926_v54 = vsel %vm634_vm4, %v1913_v31, %v1917_v15 }
 0x4df   : > { %v1933_v61 = vmul.f32 %v1928_v43, %v4003_v3 }
 0x4e1   : > { %v1921_v22 = vpop.permute.xlu1 %1920  ;;  %v2112_v18 = vpop.permute.xlu0 %2111  ;;  %v1941_v34 = vadd.f32 %v1933_v61, %v1738_v59 }
 0x4e2   : > { %v1930_v44 = vsel %vm634_vm4, %v1921_v22, %v1909_v53  ;;  %v1924_v33 = vsel %vm634_vm4, %v1917_v15, %v1921_v22 }
 0x4e3   : > { %v1932_v60 = vmul.f32 %v1930_v44, %v4009_v5  ;;  %v1537_v44 = vadd.f32 %v4623_v40, %v1519_v14  ;;  %v1935_v22 = vmul.f32 %v1924_v33, %v4012_v6 }
 0x4e5   : > { %v2116_v36 = vpop.permute.xlu1 %2115  ;;  %v2120_v26 = vpop.permute.xlu0 %2119  ;;  %v1940_v24 = vadd.f32 %v1932_v60, %v1737_v57 }
 0x4e6   : > { %v2131_v10 = vsel %vm674_vm5, %v2112_v18, %v2116_v36  ;;  %v2129_v31 = vsel %vm674_vm5, %v2116_v36, %v2120_v26  ;;  %v1740_v36 = vadd.f32 %v1732_v49, %v1537_v44 }
 0x4e7   : > { %v2136_v43 = vmul.f32 %v2131_v10, %v5021_v37  ;;  %v5022_v10 = vld [vmem:[#allocation11_spill] sm:$0xff] }
 0x4e8   : > { %v2137_v37 = vmul.f32 %v2129_v31, %v5022_v10  ;;  %v1943_v40 = vadd.f32 %v1935_v22, %v1740_v36 }
 0x4e9   : > { %v2124_v20 = vpop.permute.xlu1 %2123  ;;  %v2144_v58 = vadd.f32 %v2136_v43, %v1941_v34 }
 0x4ea   : > { %v2133_v53 = vsel %vm674_vm5, %v2124_v20, %v2112_v18  ;;  %v1934_v18 = vmul.f32 %v1926_v54, %v4006_v4  ;;  %v2127_v46 = vsel %vm674_vm5, %v2120_v26, %v2124_v20 }
 0x4eb   : > { %v2135_v23 = vmul.f32 %v2133_v53, %v4029_v12  ;;  %v2138_v16 = vmul.f32 %v2127_v46, %v5023_v2  ;;  %v2315_v60 = vadd.f32 %v4545_v13, %v2144_v58 }
 0x4ec   : > { %v1942_v54 = vadd.f32 %v1934_v18, %v1739_v8 }
 0x4ed   : > { %v2143_v53 = vadd.f32 %v2135_v23, %v1940_v24  ;;  %v2146_v33 = vadd.f32 %v2138_v16, %v1943_v40 }
 0x4ee   : > { %v2145_v57 = vadd.f32 %v2137_v37, %v1942_v54 }
 0x4ef   : > { %v2314_v43 = vadd.f32 %v4540_v11, %v2143_v53 }
 0x4f0   : > { %v2316_v11 = vadd.f32 %v4542_v19, %v2145_v57 }
 0x4f1   : > { %v4633_v17 = vpop.permute.xlu0 %2485 }
 0x4f2   : > { %v2490_v52 = vpop.permute.xlu1 %2489 }
 0x4f3   : > { %v2505_v26 = vsel %vm714_vm6, %v4633_v17, %v2490_v52 }
 0x4f4   : > { %v2509_v32 = vmul.f32 %v2505_v26, %v4040_v25 }
 0x4f5   : > { %v2494_v30 = vpop.permute.xlu0 %2493 }
 0x4f6   : > { %v2498_v1 = vpop.permute.xlu1 %2497  ;;  %v2503_v59 = vsel %vm714_vm6, %v2490_v52, %v2494_v30 }
 0x4f7   : > { %v2501_v14 = vsel %vm714_vm6, %v2494_v30, %v2498_v1  ;;  %v2507_v48 = vsel %vm714_vm6, %v2498_v1, %v4633_v17  ;;  %v2510_v37 = vmul.f32 %v2503_v59, %v4043_v28  ;;  %v2517_v17 = vadd.f32 %v2509_v32, %v2314_v43 }
 0x4f8   : > { %v2511_v46 = vmul.f32 %v2501_v14, %v4049_v41  ;;  %v2512_v1 = vmul.f32 %v2507_v48, %v4052_v42 }
 0x4f9   : > { %v2689_v21 = vpop.permute.xlu0 %2688 }
 0x4fa   : > { %v2693_v55 = vpop.permute.xlu1 %2692  ;;  %v2519_v16 = vadd.f32 %v2511_v46, %v2316_v11 }
 0x4fb   : > { %v2708_v61 = vsel %vm754_vm7, %v2689_v21, %v2693_v55 }
 0x4fc   : > { %v2712_v31 = vmul.f32 %v2708_v61, %v4160_v56 }
 0x4fd   : > { %v2697_v3 = vpop.permute.xlu0 %2696 }
 0x4fe   : > { %v2701_v15 = vpop.permute.xlu1 %2700  ;;  %v2706_v30 = vsel %vm754_vm7, %v2693_v55, %v2697_v3  ;;  %v2317_v55 = vadd.f32 %v4547_v38, %v2146_v33 }
 0x4ff   : > { %v2704_v58 = vsel %vm754_vm7, %v2697_v3, %v2701_v15  ;;  %v2710_v13 = vsel %vm754_vm7, %v2701_v15, %v2689_v21  ;;  %v2713_v34 = vmul.f32 %v2706_v30, %v4079_v7  ;;  %v2518_v21 = vadd.f32 %v2510_v37, %v2315_v60 }
 0x500   : > { %v2720_v15 = vadd.f32 %v2712_v31, %v2517_v17  ;;  %v2714_v19 = vmul.f32 %v2704_v58, %v4132_v0  ;;  %v2715_v24 = vmul.f32 %v2710_v13, %v4073_v47 }
 0x501   : > { %v2892_v20 = vpop.permute.xlu0 %2891  ;;  %v2721_v59 = vadd.f32 %v2713_v34, %v2518_v21 }
 0x502   : > { %v2896_v4 = vpop.permute.xlu1 %2895  ;;  %v2722_v57 = vadd.f32 %v2714_v19, %v2519_v16  ;;  %v5025_v19 = vld [vmem:[#allocation17_spill] sm:$0xff]  ;;  %v5028_v16 = vld [vmem:[#allocation19_spill] sm:$0xff] }
 0x503   : > { %v2911_v49 = vsel %vm794_vm8, %v2892_v20, %v2896_v4 }
 0x504   : > { %v2915_v23 = vmul.f32 %v2911_v49, %v4137_v45 }
 0x505   : > { %v2900_v52 = vpop.permute.xlu0 %2899 }
 0x506   : > { %v2904_v18 = vpop.permute.xlu1 %2903  ;;  %v2909_v44 = vsel %vm794_vm8, %v2896_v4, %v2900_v52  ;;  %v2520_v4 = vadd.f32 %v2512_v1, %v2317_v55  ;;  %v2923_v54 = vadd.f32 %v2915_v23, %v2720_v15  ;;  %v5024_v15 = vld [vmem:[#allocation16_spill] sm:$0xff] }
 0x507   : > { %v2907_v22 = vsel %vm794_vm8, %v2900_v52, %v2904_v18  ;;  %v2913_v3 = vsel %vm794_vm8, %v2904_v18, %v2892_v20  ;;  %v2916_v38 = vmul.f32 %v2909_v44, %v4152_v27 }
 0x508   : > { %v2917_v53 = vmul.f32 %v2907_v22, %v4155_v9  ;;  %v2918_v20 = vmul.f32 %v2913_v3, %v4140_v50  ;;  %v2723_v32 = vadd.f32 %v2715_v24, %v2520_v4  ;;  %v5026_v24 = vld [vmem:[#allocation15_spill] sm:$0xff]  ;;  %v5029_v4 = vld [vmem:[#allocation25_spill] sm:$0xff] }
 0x509   : > { %v3095_v8 = vpop.permute.xlu0 %3094  ;;  %v2924_v60 = vadd.f32 %v2916_v38, %v2721_v59  ;;  %v5030_v38 = vld [vmem:[#allocation18_spill] sm:$0xff] }
 0x50a   : > { %v3099_v36 = vpop.permute.xlu1 %3098  ;;  %v2925_v37 = vadd.f32 %v2917_v53, %v2722_v57  ;;  %v2926_v31 = vadd.f32 %v2918_v20, %v2723_v32  ;;  %v5033_v53 = vld [vmem:[#allocation29_spill] sm:$0xff]  ;;  %v5034_v20 = vld [vmem:[#allocation27_spill] sm:$0xff]  ;;  %v5036_v59 = vld [vmem:[#allocation30_spill] sm:$0xff] }
 0x50b   : > { %v3114_v26 = vsel %vm834_vm9, %v3095_v8, %v3099_v36  ;;  %v5038_v57 = vld [vmem:[#allocation31_spill] sm:$0xff]  ;;  %v5039_v32 = vld [vmem:[#allocation36_spill] sm:$0xff] }
 0x50c   : > { %v3118_v40 = vmul.f32 %v3114_v26, %v4196_v35  ;;  %v5031_v26 = vld [vmem:[#allocation28_spill] sm:$0xff] }
 0x50d   : > { %v3103_v61 = vpop.permute.xlu0 %3102 }
 0x50e   : > { %v3126_v14 = vadd.f32 %v3118_v40, %v2923_v54  ;;  %v3112_v48 = vsel %vm834_vm9, %v3099_v36, %v3103_v61  ;;  %v3107_v33 = vpop.permute.xlu1 %3106  ;;  %v5027_v36 = vld [vmem:[#allocation24_spill] sm:$0xff]  ;;  %v5032_v54 = vld [vmem:[#allocation26_spill] sm:$0xff] }
 0x50f   : > { %v3119_v49 = vmul.f32 %v3112_v48, %v4190_v51  ;;  %v3110_v52 = vsel %vm834_vm9, %v3103_v61, %v3107_v33  ;;  %v3116_v43 = vsel %vm834_vm9, %v3107_v33, %v3095_v8  ;;  %v5035_v40 = vld [vmem:[#allocation32_spill] sm:$0xff]  ;;  %v5037_v61 = vld [vmem:[#allocation33_spill] sm:$0xff]  ;;  %v5042_v33 = vld [vmem:[#allocation35_spill] sm:$0xff] }
 0x510   : > { %v3120_v30 = vmul.f32 %v3110_v52, %v4193_v63  ;;  %v3121_v18 = vmul.f32 %v3116_v43, %v4187_v39  ;;  %3674 = vtanh.f32 %v3126_v14  ;;  %v5040_v14 = vld [vmem:[#allocation34_spill] sm:$0xff]  ;;  %v5041_v48 = vld [vmem:[#allocation37_spill] sm:$0xff] }
 0x511   : > { %v3127_v46 = vadd.f32 %v3119_v49, %v2924_v60  ;;  %v5043_v60 = vld [vmem:[#allocation38_spill] sm:$0xff]  ;;  %v5044_v49 = vld [vmem:[#allocation39_spill] sm:$0xff] }
 0x512   : > { %v3128_v1 = vadd.f32 %v3120_v30, %v2925_v37  ;;  %v3129_v58 = vadd.f32 %v3121_v18, %v2926_v31 }
 0x513   : > { %3676 = vtanh.f32 %v3127_v46 }
 0x514   : > { %3678 = vtanh.f32 %v3128_v1 }
 0x515   : > { %3680 = vtanh.f32 %v3129_v58 }
 0x51a   : > { %v3675_v13 = vpop.eup %3674 }
 0x51d   : > { %v3677_v17 = vpop.eup %3676 }
 0x51e   : > { %v3679_v11 = vpop.eup %3678  ;;  %v3140_v23 = vpop.permute.xlu0 %3139 }
 0x51f   : > { %v3681_v44 = vpop.eup %3680  ;;  %v4741_v55 = vmul.f32 %v3679_v11, %v3140_v23  ;;  %v4743_v34 = vmul.f32 %v3675_v13, %v3140_v23  ;;  %v4745_v22 = vmul.f32 %v3677_v17, %v3140_v23  ;;  %v4795_v52 = vpop.permute.xlu1 %1531 }
 0x520   : > { %v4747_v3 = vmul.f32 %v3681_v44, %v3140_v23 }
 0x521   : > { %v3166_v8 = vadd.f32 %v4745_v22, %v4743_v34 }
 0x522   : > { %v3178_v21 = vadd.f32 %v4747_v3, %v4741_v55  ;;  %v1495_v31 = vpop.permute.xlu0 %1494 }
 0x523   : > { %3167 = vadd.xlane.f32.xlu1 %v3166_v8  ;;  %v1499_v43 = vpop.permute.xlu1 %1498 }
 0x524   : > { %3179 = vadd.xlane.f32.xlu0 %v3178_v21 }
 0x526   : > { %v1507_v18 = vpop.permute.xlu0 %1506 }
 0x527   : > { %v1503_v37 = vpop.permute.xlu1 %1502 }
 0x52a   : > { %v1712_v1 = vpop.permute.xlu0 %1711 }
 0x52b   : > { %v1708_v30 = vpop.permute.xlu1 %1707 }
 0x52e   : > { %v1720_v13 = vpop.permute.xlu0 %1719 }
 0x52f   : > { %v1716_v46 = vpop.permute.xlu1 %1715 }
 0x532   : > { %v1915_v11 = vpop.permute.xlu0 %1914 }
 0x533   : > { %v1911_v58 = vpop.permute.xlu1 %1910 }
 0x534   : > { %2113 = vrot.lane.b32.xlu1 %v5024_v15, %s3718_s19 }
 0x537   : > { %v1919_v17 = vpop.permute.xlu1 %1918 }
 0x538   : > { %2121 = vrot.lane.b32.xlu1 %v5025_v19, %s3718_s19 }
 0x53a   : > { %1922 = vrot.lane.b32.xlu0 %v5026_v24, %s3717_s18 }
 0x53c   : > { %2487 = vrot.lane.b32.xlu1 %v5027_v36, %s3719_s20 }
 0x53e   : > { %2117 = vrot.lane.b32.xlu0 %v5028_v16, %s3718_s19 }
 0x540   : > { %2495 = vrot.lane.b32.xlu1 %v5029_v4, %s3719_s20 }
 0x542   : > { %2125 = vrot.lane.b32.xlu0 %v5030_v38, %s3718_s19 }
 0x544   : > { %2690 = vrot.lane.b32.xlu1 %v5031_v26, %s3720_s21 }
 0x546   : > { %2491 = vrot.lane.b32.xlu0 %v5032_v54, %s3719_s20 }
 0x548   : > { %2698 = vrot.lane.b32.xlu1 %v5033_v53, %s3720_s21 }
 0x54a   : > { %2499 = vrot.lane.b32.xlu0 %v5034_v20, %s3719_s20  ;;  %s340_s20 = scalar_lea.vmem %s4959_s9, %s3320_s15 }
 0x54c   : > { %2893 = vrot.lane.b32.xlu1 %v5035_v40, %s3721_s22 }
 0x54e   : > { %2694 = vrot.lane.b32.xlu0 %v5036_v59, %s3720_s21 }
 0x550   : > { %2901 = vrot.lane.b32.xlu1 %v5037_v61, %s3721_s22 }
 0x552   : > { %2702 = vrot.lane.b32.xlu0 %v5038_v57, %s3720_s21 }
 0x554   : > { %3096 = vrot.lane.b32.xlu1 %v5039_v32, %s3722_s23 }
 0x556   : > { %2897 = vrot.lane.b32.xlu0 %v5040_v14, %s3721_s22  ;;  %v1513_v14 = vsel %vm555_vm2, %v1495_v31, %v1499_v43 }
 0x558   : > { %3104 = vrot.lane.b32.xlu1 %v5041_v48, %s3722_s23  ;;  %v1515_v48 = vsel %vm555_vm2, %v1507_v18, %v1495_v31  ;;  %v1726_v31 = vsel %vm594_vm3, %v1708_v30, %v1712_v1 }
 0x55a   : > { %2905 = vrot.lane.b32.xlu0 %v5042_v33, %s3721_s22 }
 0x55e   : > { %3100 = vrot.lane.b32.xlu0 %v5043_v60, %s3722_s23  ;;  %v5045_v60 = vld [vmem:[#allocation13_spill] sm:$0xff] }
 0x562   : > { %3108 = vrot.lane.b32.xlu0 %v5044_v49, %s3722_s23  ;;  %v1521_v49 = vmul.f32 %v1513_v14, %v5045_v60  ;;  %v1929_v14 = vsel %vm634_vm4, %v1911_v58, %v1915_v11  ;;  %s3411_s23 = sshll.u32 (%p3800_p4), %s3788_s12, 5 }
 0x563   : > { %s3203_s29 = scalar_lea.vmem (%p3800_p4), %s4958_s8, %s3411_s23 }
 0x5b0   : > { %v3168_v23 = vpop.xlane.xlu1 %3167 }
 0x5b1   : > { %v3169_v44 = vrot.slane %v3168_v23, 4  ;;  %v3180_v8 = vpop.xlane.xlu0 %3179 }
 0x5b2   : > { %v3181_v21 = vrot.slane %v3180_v8, 4 }
 0x5b3   : > { %v3170_v15 = vadd.f32 %v3169_v44, %v3168_v23  ;;  %v1728_v44 = vsel %vm594_vm3, %v1720_v13, %v1708_v30 }
 0x5b4   : > { %v3182_v19 = vadd.f32 %v3181_v21, %v3180_v8  ;;  %v2114_v24 = vpop.permute.xlu1 %2113  ;;  %v5046_v8 = vld [vmem:[#allocation5_spill] sm:$0xff] }
 0x5b5   : > { %v3171_v36 = vrot.slane %v3170_v15, 2  ;;  %v1923_v16 = vpop.permute.xlu0 %1922  ;;  %v1520_v21 = vmul.f32 %v1515_v48, %v5046_v8  ;;  %v5051_v8 = vld [vmem:[#allocation4_spill] sm:$0xff] }
 0x5b6   : > { %v3183_v4 = vrot.slane %v3182_v19, 2 }
 0x5b7   : > { %v3172_v38 = vadd.f32 %v3171_v36, %v3170_v15  ;;  %v1509_v15 = vsel %vm555_vm2, %v1503_v37, %v1507_v18  ;;  %v3154_v36 = vmul.f32 1.442695, %v4741_v55  ;;  %v1722_v18 = vsel %vm594_vm3, %v1716_v46, %v1720_v13  ;;  %v5048_v55 = vld [vmem:[#allocation14_spill] sm:$0xff] }
 0x5b8   : > { %v2122_v26 = vpop.permute.xlu1 %2121  ;;  %v3184_v54 = vadd.f32 %v3183_v4, %v3182_v19  ;;  %v1511_v19 = vsel %vm555_vm2, %v1499_v43, %v1503_v37  ;;  %v1931_v4 = vsel %vm634_vm4, %v1923_v16, %v1911_v58  ;;  %v1724_v43 = vsel %vm594_vm3, %v1712_v1, %v1716_v46 }
 0x5b9   : > { %v2118_v53 = vpop.permute.xlu0 %2117  ;;  %v3173_v20 = vrot.slane %v3172_v38, 1  ;;  %v1538_v60 = vadd.f32 %v4795_v52, %v1520_v21  ;;  %v1927_v13 = vsel %vm634_vm4, %v1915_v11, %v1919_v17  ;;  %v1936_v46 = vmul.f32 %v1931_v4, %v4009_v5  ;;  %v5052_v21 = vld [vmem:[#allocation8_spill] sm:$0xff] }
 0x5ba   : > { %v3185_v40 = vrot.slane %v3184_v54, 1  ;;  %v1735_v1 = vmul.f32 %v1724_v43, %v3997_v62  ;;  %v2132_v58 = vsel %vm674_vm5, %v2114_v24, %v2118_v53  ;;  %3682 = vpow2.f32 %v3154_v36 }
 0x5bb   : > { %v3174_v59 = vadd.f32 %v3173_v20, %v3172_v38  ;;  %v5047_v20 = vld [vmem:[#allocation6_spill] sm:$0xff] }
 0x5bc   : > { %v4797_v61 = vpop.permute.xlu1 %2487  ;;  %v3186_v57 = vadd.f32 %v3185_v40, %v3184_v54  ;;  %v1539_v54 = vadd.f32 %v4795_v52, %v1521_v49  ;;  %v1733_v40 = vmul.f32 %v1728_v44, %v5047_v20  ;;  %v5050_v49 = vld [vmem:[#allocation7_spill] sm:$0xff] }
 0x5bd   : > { %v2126_v32 = vpop.permute.xlu0 %2125  ;;  %3628 = vpush %v3174_v59  ;;  %v1522_v59 = vmul.f32 %v1511_v19, %v5048_v55  ;;  %v1734_v44 = vmul.f32 %v1726_v31, %v5050_v49  ;;  %v1736_v19 = vmul.f32 %v1722_v18, %v5051_v8  ;;  %v2130_v31 = vsel %vm674_vm5, %v2118_v53, %v2122_v26  ;;  %v5053_v18 = vld [vmem:[#allocation9_spill] sm:$0xff] }
 0x5be   : > { %3630 = vpush %v3186_v57  ;;  %v5049_v57 = vld [vmem:[#allocation3_spill] sm:$0xff]  ;;  %v2134_v48 = vsel %vm674_vm5, %v2126_v32, %v2114_v24  ;;  %v1741_v55 = vadd.f32 %v1733_v40, %v1538_v60  ;;  %v1938_v43 = vmul.f32 %v1927_v13, %v5053_v18  ;;  %v3152_v53 = vmul.f32 1.442695, %v4745_v22 }
 0x5bf   : > { %v1523_v30 = vmul.f32 %v1509_v15, %v5049_v57  ;;  %v1925_v15 = vsel %vm634_vm4, %v1919_v17, %v1923_v16  ;;  %v1937_v57 = vmul.f32 %v1929_v14, %v5052_v21  ;;  %v2139_v11 = vmul.f32 %v2134_v48, %v4029_v12  ;;  %v5054_v14 = vld [vmem:[#allocation10_spill] sm:$0xff] }
 0x5c0   : > { %v4803_v33 = vpop.permute.xlu1 %2495  ;;  %v1540_v62 = vadd.f32 %v4795_v52, %v1522_v59  ;;  %v2128_v17 = vsel %vm674_vm5, %v2122_v26, %v2126_v32  ;;  %v1742_v24 = vadd.f32 %v1734_v44, %v1539_v54  ;;  %v1939_v16 = vmul.f32 %v1925_v15, %v4012_v6 }
 0x5c1   : > { %v2492_v23 = vpop.permute.xlu0 %2491  ;;  %v1541_v4 = vadd.f32 %v4795_v52, %v1523_v30  ;;  %v1944_v40 = vadd.f32 %v1936_v46, %v1741_v55  ;;  %v2140_v60 = vmul.f32 %v2132_v58, %v5054_v14  ;;  %v2141_v12 = vmul.f32 %v2130_v31, %v5022_v10 }
 0x5c2   : > { %v1743_v49 = vadd.f32 %v1735_v1, %v1540_v62  ;;  %v1945_v8 = vadd.f32 %v1937_v57, %v1742_v24  ;;  %v2142_v52 = vmul.f32 %v2128_v17, %v5023_v2  ;;  %v3150_v26 = vmul.f32 1.442695, %v4743_v34  ;;  %v5055_v1 = vld [vmem:[#allocation20_spill] sm:$0xff]  ;;  %v5058_v24 = vld [vmem:[#allocation23_spill] sm:$0xff] }
 0x5c3   : > { %v1744_v59 = vadd.f32 %v1736_v19, %v1541_v4  ;;  %v2147_v30 = vadd.f32 %v2139_v11, %v1944_v40  ;;  %v2504_v22 = vsel %vm714_vm6, %v2492_v23, %v4803_v33  ;;  %v2506_v10 = vsel %vm714_vm6, %v4797_v61, %v2492_v23 }
 0x5c4   : > { %v4818_v38 = vpop.permute.xlu1 %2690  ;;  %v1946_v32 = vadd.f32 %v1938_v43, %v1743_v49  ;;  %v2148_v54 = vadd.f32 %v2140_v60, %v1945_v8  ;;  %3684 = vpow2.f32 %v3152_v53  ;;  %v2513_v58 = vmul.f32 %v2506_v10, %v4040_v25  ;;  %v5057_v43 = vld [vmem:[#allocation21_spill] sm:$0xff]  ;;  %v3683_v14 = vpop.eup %3682 }
 0x5c5   : > { %v2500_v37 = vpop.permute.xlu0 %2499  ;;  %v1947_v6 = vadd.f32 %v1939_v16, %v1744_v59  ;;  %v2318_v19 = vadd.f32 %v5055_v1, %v2147_v30  ;;  %v2514_v55 = vmul.f32 %v2504_v22, %v4043_v28  ;;  %v3156_v57 = vmul.f32 1.442695, %v4747_v3 }
 0x5c6   : > { %v2149_v44 = vadd.f32 %v2141_v12, %v1946_v32  ;;  %v2502_v34 = vsel %vm714_vm6, %v4803_v33, %v2500_v37  ;;  %v2508_v36 = vsel %vm714_vm6, %v2500_v37, %v4797_v61  ;;  %3686 = vpow2.f32 %v3150_v26  ;;  %v5056_v33 = vld [vmem:[#allocation22_spill] sm:$0xff] }
 0x5c7   : > { %v2150_v2 = vadd.f32 %v2142_v52, %v1947_v6  ;;  %v2319_v31 = vadd.f32 %v5056_v33, %v2148_v54  ;;  %v2515_v11 = vmul.f32 %v2502_v34, %v4049_v41  ;;  %v2516_v61 = vmul.f32 %v2508_v36, %v4052_v42 }
 0x5c8   : > { %v2699_v20 = vpop.permute.xlu1 %2698  ;;  %v2521_v42 = vadd.f32 %v2513_v58, %v2318_v19  ;;  %v2320_v17 = vadd.f32 %v5057_v43, %v2149_v44  ;;  %3688 = vpow2.f32 %v3156_v57 }
 0x5c9   : > { %v2695_v5 = vpop.permute.xlu0 %2694  ;;  %v2522_v18 = vadd.f32 %v2514_v55, %v2319_v31  ;;  %v2321_v16 = vadd.f32 %v5058_v24, %v2150_v2  ;;  %v3224_v31 = vld [vmem:[%s3832_s14 + $0x20] sm:$0xff] (%p3800_p4) }
 0x5ca   : > { %v2707_v23 = vsel %vm754_vm7, %v2695_v5, %v2699_v20  ;;  %v2709_v21 = vsel %vm754_vm7, %v4818_v38, %v2695_v5  ;;  %v2523_v49 = vadd.f32 %v2515_v11, %v2320_v17  ;;  %v3226_v11 = vld [vmem:[%s3832_s14 + $0x28] sm:$0xff] (%p3800_p4)  ;;  %3225 = vst [vmem:[%s3203_s29 + $0x40] sm:$0xff] (%p3800_p4), %v3224_v31 }
 0x5cb   : > { %v2716_v62 = vmul.f32 %v2709_v21, %v4160_v56  ;;  %v2717_v5 = vmul.f32 %v2707_v23, %v4079_v7  ;;  %v2524_v12 = vadd.f32 %v2516_v61, %v2321_v16  ;;  %3227 = vst [vmem:[%s3203_s29 + $0x48] sm:$0xff] (%p3800_p4), %v3226_v11  ;;  %v3228_v61 = vld [vmem:[%s3832_s14 + $0x30] sm:$0xff] (%p3800_p4) }
 0x5cc   : > { %v2894_v48 = vpop.permute.xlu1 %2893  ;;  %3229 = vst [vmem:[%s3203_s29 + $0x50] sm:$0xff] (%p3800_p4), %v3228_v61 }
 0x5cd   : > { %v2703_v13 = vpop.permute.xlu0 %2702  ;;  %v2724_v59 = vadd.f32 %v2716_v62, %v2521_v42  ;;  %v2725_v8 = vadd.f32 %v2717_v5, %v2522_v18 }
 0x5ce   : > { %v2705_v3 = vsel %vm754_vm7, %v2699_v20, %v2703_v13  ;;  %v2711_v41 = vsel %vm754_vm7, %v2703_v13, %v4818_v38  ;;  %v3685_v52 = vpop.eup %3684 }
 0x5cf   : > { %v2718_v38 = vmul.f32 %v2705_v3, %v4132_v0  ;;  %v2719_v60 = vmul.f32 %v2711_v41, %v4073_v47 }
 0x5d0   : > { %v2902_v46 = vpop.permute.xlu1 %2901  ;;  %v3687_v22 = vpop.eup %3686 }
 0x5d1   : > { %v2898_v15 = vpop.permute.xlu0 %2897  ;;  %v2726_v6 = vadd.f32 %v2718_v38, %v2523_v49  ;;  %v2727_v54 = vadd.f32 %v2719_v60, %v2524_v12 }
 0x5d2   : > { %v2910_v25 = vsel %vm794_vm8, %v2898_v15, %v2902_v46  ;;  %v2912_v28 = vsel %vm794_vm8, %v2894_v48, %v2898_v15  ;;  %v3689_v58 = vpop.eup %3688 }
 0x5d3   : > { %v2919_v40 = vmul.f32 %v2912_v28, %v4137_v45  ;;  %v2920_v56 = vmul.f32 %v2910_v25, %v4152_v27  ;;  %v3230_v25 = vld [vmem:[%s3832_s14 + $0x38] sm:$0xff] (%p3800_p4) }
 0x5d4   : > { %v3097_v37 = vpop.permute.xlu1 %3096  ;;  %3231 = vst [vmem:[%s3203_s29 + $0x58] sm:$0xff] (%p3800_p4), %v3230_v25 }
 0x5d5   : > { %v2906_v4 = vpop.permute.xlu0 %2905  ;;  %v2927_v0 = vadd.f32 %v2919_v40, %v2724_v59  ;;  %v2928_v26 = vadd.f32 %v2920_v56, %v2725_v8 }
 0x5d6   : > { %v2908_v7 = vsel %vm794_vm8, %v2902_v46, %v2906_v4  ;;  %v2914_v20 = vsel %vm794_vm8, %v2906_v4, %v2894_v48 }
 0x5d7   : > { %v2921_v27 = vmul.f32 %v2908_v7, %v4155_v9  ;;  %v2922_v30 = vmul.f32 %v2914_v20, %v4140_v50 }
 0x5d8   : > { %v3105_v53 = vpop.permute.xlu1 %3104 }
 0x5d9   : > { %v3101_v45 = vpop.permute.xlu0 %3100  ;;  %v2929_v44 = vadd.f32 %v2921_v27, %v2726_v6  ;;  %v2930_v46 = vadd.f32 %v2922_v30, %v2727_v54 }
 0x5da   : > { %v3113_v48 = vsel %vm834_vm9, %v3101_v45, %v3105_v53  ;;  %v3115_v13 = vsel %vm834_vm9, %v3097_v37, %v3101_v45 }
 0x5db   : > { %v3122_v47 = vmul.f32 %v3115_v13, %v4196_v35  ;;  %v3123_v32 = vmul.f32 %v3113_v48, %v4190_v51 }
 0x5dd   : > { %v3130_v9 = vadd.f32 %v3122_v47, %v2927_v0  ;;  %v3131_v50 = vadd.f32 %v3123_v32, %v2928_v26  ;;  %v3109_v10 = vpop.permute.xlu0 %3108 }
 0x5de   : > { %v3111_v2 = vsel %vm834_vm9, %v3105_v53, %v3109_v10  ;;  %v3117_v35 = vsel %vm834_vm9, %v3109_v10, %v3097_v37 }
 0x5df   : > { %v3158_v51 = vmul.f32 %v3687_v22, %v3130_v9  ;;  %v3159_v1 = vmul.f32 %v3685_v52, %v3131_v50  ;;  %v3124_v19 = vmul.f32 %v3111_v2, %v4193_v63  ;;  %v3125_v34 = vmul.f32 %v3117_v35, %v4187_v39 }
 0x5e1   : > { %3162 = vst [vmem:[%s3832_s14] sm:$0xff] %v3158_v51  ;;  %3163 = vst [vmem:[%s3832_s14 + $0x8] sm:$0xff] %v3159_v1  ;;  %v3132_v36 = vadd.f32 %v3124_v19, %v2929_v44  ;;  %v3133_v15 = vadd.f32 %v3125_v34, %v2930_v46 }
 0x5e3   : > { %v3160_v55 = vmul.f32 %v3683_v14, %v3132_v36  ;;  %v3161_v23 = vmul.f32 %v3689_v58, %v3133_v15 }
 0x5e5   : > { %3164 = vst [vmem:[%s3832_s14 + $0x10] sm:$0xff] %v3160_v55  ;;  %3165 = vst [vmem:[%s3832_s14 + $0x18] sm:$0xff] %v3161_v23 }
 0x5e8   : > { %v3216_v63 = vld [vmem:[%s3832_s14] sm:$0xff] (%p3800_p4)  ;;  %v3218_v21 = vld [vmem:[%s3832_s14 + $0x8] sm:$0xff] (%p3800_p4) }
 0x5e9   : > { %3217 = vst [vmem:[%s3203_s29] sm:$0xff] (%p3800_p4), %v3216_v63  ;;  %3219 = vst [vmem:[%s3203_s29 + $0x8] sm:$0xff] (%p3800_p4), %v3218_v21 }
 0x5eb   : > { %3200 = sbr.rel (!%p3800_p4) target bundleno = 1522 (0x5f2), region = 56 }
 0x5ec   : > { %v3220_v57 = vld [vmem:[%s3832_s14 + $0x10] sm:$0xff] (%p3800_p4)  ;;  %v3222_v33 = vld [vmem:[%s3832_s14 + $0x18] sm:$0xff] (%p3800_p4) }
 0x5ed   : > { %3221 = vst [vmem:[%s3203_s29 + $0x10] sm:$0xff] (%p3800_p4), %v3220_v57  ;;  %3223 = vst [vmem:[%s3203_s29 + $0x18] sm:$0xff] (%p3800_p4), %v3222_v33 }
 0x5ee   : > { %s3629_s21 = spop %3628 }
 0x5ef   : > { %v3176_v29 = vstv %s3629_s21  ;;  %s3631_s22 = spop %3630 }
 0x5f0   : > { %3177 = vst [vmem:[%s340_s20] sm:$0x1] %v3176_v29  ;;  %v3188_v39 = vstv %s3631_s22 }
 0x5f1   : > { %3189 = vst [vmem:[%s340_s20 + $0x1] sm:$0x1] %v3188_v39 }
 0x5f2 PF: > { %p17_p9 = scmp.ge.s32.totalorder %s3790_s13, 4   ;;  %s5059_s30 = smov %s3708_s10 }
 0x5f3   : > { %s5060_s10 = smov %s3798_s16  ;;  %s5061_s11 = smov %s3790_s13 }
 0x5f4   :  { %19 = sbr.rel (!%p17_p9) target bundleno = 2 (0x2), region = 132 }

</bundles_post_ra>
